<compile_context>
chip_gen: v7x
topology: tpu7x:2x2x1
jax: 0.10.0
libtpu: 0.0.40
codegen_flags: <defaults>
</compile_context>

<pallas_src>
import functools

import jax
import jax.numpy as jnp
from jax import lax
from jax.experimental import pallas as pl
from jax.experimental.pallas import tpu as pltpu


# --------------------------------------------------------------------------
# Fused Pallas kernel: all LSTM layers + fc_regression in one call
# --------------------------------------------------------------------------
def fused_lstm_fc_kernel(*refs, num_layers, hidden_size, seq_len, batch_tile,
                         use_scratch, hoist_weights):
    """Ref layout (positional):
      in : x_ref (T, BT, I),
           per layer: wih_ref (in_l, 4H), whh_ref (H, 4H), b_ref (1, 4H),
           wfc_ref (H, O), bfc_ref (1, O)
      out: out_ref (BT, O)
      scratch (only if use_scratch): xw_ref (T, BT, 4H), hseq_ref (T, BT, H)
    Gate blocks along 4H are pre-ordered [i, f, o, g].
    """
    H, T, B, L = hidden_size, seq_len, batch_tile, num_layers

    x_ref = refs[0]
    layer_refs = [refs[1 + 3 * l: 4 + 3 * l] for l in range(L)]
    base = 1 + 3 * L
    wfc_ref, bfc_ref = refs[base], refs[base + 1]
    out_ref = refs[base + 2]
    if use_scratch:
        xw_ref, hseq_ref = refs[base + 3], refs[base + 4]

    # ---- weight accessors: hoist into values only when small (H <= 64) -----
    if hoist_weights:
        wih_v = [layer_refs[l][0][...] for l in range(L)]
        whh_v = [layer_refs[l][1][...] for l in range(L)]
        b_v = [layer_refs[l][2][...] for l in range(L)]
        wih = lambda l: wih_v[l]
        whh = lambda l: whh_v[l]
        bias = lambda l: b_v[l]
    else:
        wih = lambda l: layer_refs[l][0][...]
        whh = lambda l: layer_refs[l][1][...]
        bias = lambda l: layer_refs[l][2][...]

    def lstm_cell(pre, h_prev, c_prev, l):
        """pre = input projection (incl. bias); adds recurrent term + gates."""
        gates = pre + jnp.dot(h_prev, whh(l), preferred_element_type=jnp.float32)
        # EUP passes on the FULL (B, 4H) tile (no pre-EUP lane slicing), then
        # extract the [i | f | o | g] slabs.
        sig = jax.nn.sigmoid(gates)
        tnh = jnp.tanh(gates)
        i_g = sig[:, 0 * H:1 * H]
        f_g = sig[:, 1 * H:2 * H]
        o_g = sig[:, 2 * H:3 * H]
        g_g = tnh[:, 3 * H:4 * H]
        c_new = f_g * c_prev + i_g * g_g
        h_new = o_g * jnp.tanh(c_new)
        return h_new, c_new

    if not use_scratch:
        # =============== fully unrolled WAVEFRONT schedule ===================
        # Layer-0 input projection batched over (T*B) and kept as a VALUE
        # (no VMEM scratch round-trip); bias already fused.
        x = x_ref[...]                                   # (T, B, I)
        in_dim = x.shape[-1]
        xw0 = (jnp.dot(x.reshape(T * B, in_dim), wih(0),
                       preferred_element_type=jnp.float32) + bias(0)
               ).reshape(T, B, 4 * H)

        h = [jnp.zeros((B, H), jnp.float32) for _ in range(L)]
        c = [jnp.zeros((B, H), jnp.float32) for _ in range(L)]
        prev_out = [None] * L          # hidden emitted by layer l last step

        for s in range(T + L - 1):     # wavefront steps (static unroll)
            step_out = list(prev_out)
            updates = []
            for l in range(L):
                t = s - l
                if not (0 <= t < T):
                    continue
                if l == 0:
                    pre = xw0[t]                              # static slice
                else:
                    # input projection from previous layer's output at time t
                    pre = jnp.dot(prev_out[l - 1], wih(l),
                                  preferred_element_type=jnp.float32) + bias(l)
                h_new, c_new = lstm_cell(pre, h[l], c[l], l)
                updates.append((l, h_new, c_new))
                step_out[l] = h_new
            for l, hn, cn in updates:
                h[l], c[l] = hn, cn
            prev_out = step_out

        h_last = h[L - 1]
    else:
        # =============== sequential per-layer fallback (long T) ==============
        h_last = None
        for l in range(L):
            is_last = (l == L - 1)
            x_in = x_ref[...] if l == 0 else hseq_ref[...]
            in_dim = x_in.shape[-1]
            xw = jnp.dot(x_in.reshape(T * B, in_dim), wih(l),
                         preferred_element_type=jnp.float32) + bias(l)
            xw_ref[...] = xw.reshape(T, B, 4 * H)

            def step(t, carry, _l=l, _is_last=is_last):
                h_p, c_p = carry
                h_n, c_n = lstm_cell(xw_ref[t], h_p, c_p, _l)
                if not _is_last:
                    hseq_ref[t] = h_n          # only intermediate layers
                return (h_n, c_n)

            h0 = jnp.zeros((B, H), jnp.float32)
            c0 = jnp.zeros((B, H), jnp.float32)
            h_last, _ = lax.fori_loop(0, T, step, (h0, c0), unroll=4)

    # ------------------------- fc_regression ------------------------------
    out_ref[...] = (jnp.dot(h_last, wfc_ref[...],
                            preferred_element_type=jnp.float32) + bfc_ref[...])


# --------------------------------------------------------------------------
# One-time parameter packing (transpose, gate reorder, bias fusion)
# --------------------------------------------------------------------------
def _reorder_gates(w, H):
    """PyTorch packs gates as [i, f, g, o] along the leading 4H axis.
    Reorder to [i, f, o, g] so the sigmoid slabs are contiguous."""
    return jnp.concatenate([w[:2 * H], w[3 * H:4 * H], w[2 * H:3 * H]], axis=0)


def prepare_params(params):
    """Pack weights once: W^T layouts, gate reorder, fused biases."""
    H = params["lstm"][0][1].shape[1]  # w_hh: (4H, H)
    layers = []
    for (w_ih, w_hh, b_ih, b_hh) in params["lstm"]:
        wih_t = _reorder_gates(w_ih, H).T                # (in, 4H)
        whh_t = _reorder_gates(w_hh, H).T                # (H, 4H)
        b = _reorder_gates(b_ih + b_hh, H)[None, :]      # (1, 4H)
        layers.append((wih_t, whh_t, b))
    w_fc, b_fc = params["fc"]                            # (O, H), (O,)
    return {"lstm": layers, "fc": (w_fc.T, b_fc[None, :])}


# --------------------------------------------------------------------------
# Wrapper
# --------------------------------------------------------------------------
def _nbytes(shape, dtype=jnp.float32):
    n = 1
    for d in shape:
        n *= int(d)
    return n * jnp.dtype(dtype).itemsize


def lstm_model_forward(x, packed):
    """x: (B, T, input_size) float32, batch_first like the PyTorch module.
    packed: output of prepare_params()."""
    B, T, I = x.shape
    L = len(packed["lstm"])
    H = packed["lstm"][0][1].shape[0]          # whh_t: (H, 4H)
    O = packed["fc"][0].shape[1]

    # ---- batch padding / batch-tiled grid ---------------------------------
    # Pad batch to f32 sublane width (8); padded rows never mix with real ones.
    Bp = max(8, ((B + 7) // 8) * 8)
    MAX_BT = 256
    if Bp > MAX_BT:
        BT = MAX_BT
        Bp = ((Bp + BT - 1) // BT) * BT        # re-pad to a multiple of BT
    else:
        BT = Bp
    n_btiles = Bp // BT

    # TODO(synk): at large B*T*I avoid this wrapper-side transpose+pad HBM copy
    # (let a T-chunked grid's index_map do the reordering).
    xs = jnp.transpose(x, (1, 0, 2))           # (T, B, I) time-major
    if Bp != B:
        xs = jnp.pad(xs, ((0, 0), (0, Bp - B), (0, 0)))

    unrolled = (T * L <= 64)                   # full unroll only for short T
    hoist = (H <= 64)                          # keep W_hh in vregs only if small

    flat_inputs = [xs]
    in_specs = [pl.BlockSpec((T, BT, I), lambda b: (0, b, 0))]
    for (wih_t, whh_t, bb) in packed["lstm"]:
        flat_inputs += [wih_t, whh_t, bb]
        in_specs += [
            pl.BlockSpec(wih_t.shape, lambda b: (0, 0)),
            pl.BlockSpec(whh_t.shape, lambda b: (0, 0)),
            pl.BlockSpec(bb.shape, lambda b: (0, 0)),
        ]
    wfc_t, bfc = packed["fc"]
    flat_inputs += [wfc_t, bfc]
    in_specs += [pl.BlockSpec(wfc_t.shape, lambda b: (0, 0)),
                 pl.BlockSpec(bfc.shape, lambda b: (0, 0))]
    out_specs = pl.BlockSpec((BT, O), lambda b: (b, 0))

    scratch_shapes = []
    if not unrolled:
        scratch_shapes = [
            pltpu.VMEM((T, BT, 4 * H), jnp.float32),   # batched x@W_ih + b
            pltpu.VMEM((T, BT, H), jnp.float32),       # inter-layer hseq
        ]

    # ---- VMEM budget: sized from per-tile buffers, headroom vs physical ----
    per_tile = _nbytes((T, BT, I)) + _nbytes((BT, O))
    for (wih_t, whh_t, bb) in packed["lstm"]:
        per_tile += _nbytes(wih_t.shape) + _nbytes(whh_t.shape) + _nbytes(bb.shape)
    per_tile += _nbytes(wfc_t.shape) + _nbytes(bfc.shape)
    if not unrolled:
        per_tile += _nbytes((T, BT, 4 * H)) + _nbytes((T, BT, H))
    try:
        phys = int(pltpu.get_tpu_info().vmem_capacity_bytes)
    except Exception:
        phys = 64 << 20
    cap = max(phys - (8 << 20), 16 << 20)      # headroom for Mosaic internals
    vmem_limit = int(min(max(3 * per_tile + (4 << 20), 16 << 20), cap))

    out = pl.pallas_call(
        functools.partial(fused_lstm_fc_kernel,
                          num_layers=L, hidden_size=H, seq_len=T,
                          batch_tile=BT, use_scratch=not unrolled,
                          hoist_weights=hoist),
        out_shape=jax.ShapeDtypeStruct((Bp, O), jnp.float32),
        grid=(n_btiles,),
        in_specs=in_specs,
        out_specs=out_specs,
        scratch_shapes=scratch_shapes,
        compiler_params=pltpu.CompilerParams(
            dimension_semantics=("parallel",),     # batch tiles → v7x 2 TCs
            vmem_limit_bytes=vmem_limit),
    )(*flat_inputs)
    return out[:B]


# --------------------------------------------------------------------------
# Deterministic parameter init (same shapes/init range as nn.LSTM / nn.Linear)
# --------------------------------------------------------------------------
def init_params(key, input_size, hidden_size, num_layers, output_size):
    params = {"lstm": []}
    k = 1.0 / jnp.sqrt(hidden_size)
    for layer in range(num_layers):
        in_sz = input_size if layer == 0 else hidden_size
        key, k1, k2, k3, k4 = jax.random.split(key, 5)
        w_ih = jax.random.uniform(k1, (4 * hidden_size, in_sz), jnp.float32, -k, k)
        w_hh = jax.random.uniform(k2, (4 * hidden_size, hidden_size), jnp.float32, -k, k)
        b_ih = jax.random.uniform(k3, (4 * hidden_size,), jnp.float32, -k, k)
        b_hh = jax.random.uniform(k4, (4 * hidden_size,), jnp.float32, -k, k)
        params["lstm"].append((w_ih, w_hh, b_ih, b_hh))
    key, k1, k2 = jax.random.split(key, 3)
    kf = 1.0 / jnp.sqrt(hidden_size)
    w_fc = jax.random.uniform(k1, (output_size, hidden_size), jnp.float32, -kf, kf)
    b_fc = jax.random.uniform(k2, (output_size,), jnp.float32, -kf, kf)
    params["fc"] = (w_fc, b_fc)
    return params


# --------------------------------------------------------------------------
# Pure-JAX reference (mirrors torch.nn.LSTM semantics) for validation
# --------------------------------------------------------------------------
def reference_forward(x, params):
    B, T, _ = x.shape
    xs = x
    h_last = None
    for (w_ih, w_hh, b_ih, b_hh) in params["lstm"]:
        H = w_hh.shape[1]
        h = jnp.zeros((B, H), jnp.float32)
        c = jnp.zeros((B, H), jnp.float32)
        outs = []
        for t in range(T):
            gates = xs[:, t, :] @ w_ih.T + h @ w_hh.T + b_ih + b_hh
            i_g = jax.nn.sigmoid(gates[:, 0 * H:1 * H])
            f_g = jax.nn.sigmoid(gates[:, 1 * H:2 * H])
            g_g = jnp.tanh(gates[:, 2 * H:3 * H])
            o_g = jax.nn.sigmoid(gates[:, 3 * H:4 * H])
            c = f_g * c + i_g * g_g
            h = o_g * jnp.tanh(c)
            outs.append(h)
        xs = jnp.stack(outs, axis=1)
        h_last = h
    w_fc, b_fc = params["fc"]
    return h_last @ w_fc.T + b_fc


# --------------------------------------------------------------------------
if __name__ == "__main__":
    input_size = 4
    hidden_size = 32
    num_layers = 2
    output_size = 1
    batch = 2
    seq = 8

    key = jax.random.PRNGKey(0)
    key, xkey = jax.random.split(key)
    x = jax.random.normal(xkey, (batch, seq, input_size), jnp.float32)
    params = init_params(key, input_size, hidden_size, num_layers, output_size)

    packed = prepare_params(params)          # one-time weight packing
    fwd = jax.jit(lstm_model_forward)

    out = jax.block_until_ready(fwd(x, packed))

    ref = reference_forward(x, params)
    assert out.shape == (batch, output_size)
    assert jnp.allclose(out, ref, atol=1e-5, rtol=1e-5), (out, ref)

    print("KERNEL_OK")
</pallas_src>

<mosaic_0001>
module attributes {stable_mosaic.version = 11 : i64} {
  func.func @fused_lstm_fc_kernel(%arg0: i32, %arg1: memref<8x8x4xf32, #tpu.memory_space<vmem>>, %arg2: memref<4x128xf32, #tpu.memory_space<vmem>>, %arg3: memref<32x128xf32, #tpu.memory_space<vmem>>, %arg4: memref<1x128xf32, #tpu.memory_space<vmem>>, %arg5: memref<32x128xf32, #tpu.memory_space<vmem>>, %arg6: memref<32x128xf32, #tpu.memory_space<vmem>>, %arg7: memref<1x128xf32, #tpu.memory_space<vmem>>, %arg8: memref<32x1xf32, #tpu.memory_space<vmem>>, %arg9: memref<1x1xf32, #tpu.memory_space<vmem>>, %arg10: memref<8x1xf32, #tpu.memory_space<vmem>>) attributes {dimension_semantics = [#tpu.dimension_semantics<parallel>], iteration_bounds = array<i64: 1>, scalar_prefetch = 0 : i64, scratch_operands = 0 : i64, tpu.core_type = #tpu.core_type<tc>, window_params = [{transform_indices = @transform_0, window_bounds = array<i64: 8, 8, 4>}, {pipeline_mode = #tpu.pipeline_mode<synchronous>, transform_indices = @transform_1, window_bounds = array<i64: 4, 128>}, {pipeline_mode = #tpu.pipeline_mode<synchronous>, transform_indices = @transform_2, window_bounds = array<i64: 32, 128>}, {pipeline_mode = #tpu.pipeline_mode<synchronous>, transform_indices = @transform_3, window_bounds = array<i64: 1, 128>}, {pipeline_mode = #tpu.pipeline_mode<synchronous>, transform_indices = @transform_4, window_bounds = array<i64: 32, 128>}, {pipeline_mode = #tpu.pipeline_mode<synchronous>, transform_indices = @transform_5, window_bounds = array<i64: 32, 128>}, {pipeline_mode = #tpu.pipeline_mode<synchronous>, transform_indices = @transform_6, window_bounds = array<i64: 1, 128>}, {pipeline_mode = #tpu.pipeline_mode<synchronous>, transform_indices = @transform_7, window_bounds = array<i64: 32, 1>}, {pipeline_mode = #tpu.pipeline_mode<synchronous>, transform_indices = @transform_8, window_bounds = array<i64: 1, 1>}, {transform_indices = @transform_9, window_bounds = array<i64: 8, 1>}]} {
    %c0 = arith.constant 0 : index
    %c0_0 = arith.constant 0 : index
    %0 = vector.load %arg2[%c0, %c0_0] : memref<4x128xf32, #tpu.memory_space<vmem>>, vector<4x128xf32>
    %c0_1 = arith.constant 0 : index
    %c0_2 = arith.constant 0 : index
    %1 = vector.load %arg5[%c0_1, %c0_2] : memref<32x128xf32, #tpu.memory_space<vmem>>, vector<32x128xf32>
    %c0_3 = arith.constant 0 : index
    %c0_4 = arith.constant 0 : index
    %2 = vector.load %arg3[%c0_3, %c0_4] : memref<32x128xf32, #tpu.memory_space<vmem>>, vector<32x128xf32>
    %c0_5 = arith.constant 0 : index
    %c0_6 = arith.constant 0 : index
    %3 = vector.load %arg6[%c0_5, %c0_6] : memref<32x128xf32, #tpu.memory_space<vmem>>, vector<32x128xf32>
    %c0_7 = arith.constant 0 : index
    %c0_8 = arith.constant 0 : index
    %4 = vector.load %arg4[%c0_7, %c0_8] : memref<1x128xf32, #tpu.memory_space<vmem>>, vector<1x128xf32>
    %c0_9 = arith.constant 0 : index
    %c0_10 = arith.constant 0 : index
    %5 = vector.load %arg7[%c0_9, %c0_10] : memref<1x128xf32, #tpu.memory_space<vmem>>, vector<1x128xf32>
    %c0_11 = arith.constant 0 : index
    %c0_12 = arith.constant 0 : index
    %c0_13 = arith.constant 0 : index
    %6 = vector.load %arg1[%c0_11, %c0_12, %c0_13] : memref<8x8x4xf32, #tpu.memory_space<vmem>>, vector<8x8x4xf32>
    %7 = vector.shape_cast %6 : vector<8x8x4xf32> to vector<64x4xf32>
    %cst = arith.constant dense<0.000000e+00> : vector<64x128xf32>
    %8 = tpu.matmul %7, %0, %cst {dimension_numbers = #tpu.dot_dimension_numbers<[1], [0], [0], [1], [0, 0, 1, 1], [], []>} : vector<64x4xf32>, vector<4x128xf32>, vector<64x128xf32> -> vector<64x128xf32>
    %9 = vector.broadcast %4 : vector<1x128xf32> to vector<64x128xf32>
    %10 = arith.addf %8, %9 : vector<64x128xf32>
    %11 = vector.shape_cast %10 : vector<64x128xf32> to vector<8x8x128xf32>
    %cst_14 = arith.constant 0.000000e+00 : f32
    %12 = vector.broadcast %cst_14 : f32 to vector<8x32xf32>
    %cst_15 = arith.constant 0.000000e+00 : f32
    %13 = vector.broadcast %cst_15 : f32 to vector<8x32xf32>
    %cst_16 = arith.constant 0.000000e+00 : f32
    %14 = vector.broadcast %cst_16 : f32 to vector<8x32xf32>
    %cst_17 = arith.constant 0.000000e+00 : f32
    %15 = vector.broadcast %cst_17 : f32 to vector<8x32xf32>
    %16 = vector.extract_strided_slice %11 {offsets = [0, 0, 0], sizes = [1, 8, 128], strides = [1, 1, 1]} : vector<8x8x128xf32> to vector<1x8x128xf32>
    %17 = vector.shape_cast %16 : vector<1x8x128xf32> to vector<8x128xf32>
    %cst_18 = arith.constant dense<0.000000e+00> : vector<8x128xf32>
    %18 = tpu.matmul %12, %2, %cst_18 {dimension_numbers = #tpu.dot_dimension_numbers<[1], [0], [0], [1], [0, 0, 1, 1], [], []>} : vector<8x32xf32>, vector<32x128xf32>, vector<8x128xf32> -> vector<8x128xf32>
    %19 = arith.addf %17, %18 : vector<8x128xf32>
    %20 = arith.negf %19 : vector<8x128xf32>
    %21 = math.exp %20 : vector<8x128xf32>
    %cst_19 = arith.constant 1.000000e+00 : f32
    %22 = vector.broadcast %cst_19 : f32 to vector<8x128xf32>
    %23 = arith.addf %22, %21 : vector<8x128xf32>
    %24 = arith.divf %22, %23 : vector<8x128xf32>
    %25 = math.tanh %19 : vector<8x128xf32>
    %26 = vector.extract_strided_slice %24 {offsets = [0, 0], sizes = [8, 32], strides = [1, 1]} : vector<8x128xf32> to vector<8x32xf32>
    %27 = vector.extract_strided_slice %24 {offsets = [0, 32], sizes = [8, 32], strides = [1, 1]} : vector<8x128xf32> to vector<8x32xf32>
    %28 = vector.extract_strided_slice %24 {offsets = [0, 64], sizes = [8, 32], strides = [1, 1]} : vector<8x128xf32> to vector<8x32xf32>
    %29 = vector.extract_strided_slice %25 {offsets = [0, 96], sizes = [8, 32], strides = [1, 1]} : vector<8x128xf32> to vector<8x32xf32>
    %30 = arith.mulf %27, %14 : vector<8x32xf32>
    %31 = arith.mulf %26, %29 : vector<8x32xf32>
    %32 = arith.addf %30, %31 : vector<8x32xf32>
    %33 = math.tanh %32 : vector<8x32xf32>
    %34 = arith.mulf %28, %33 : vector<8x32xf32>
    %35 = vector.extract_strided_slice %11 {offsets = [1, 0, 0], sizes = [1, 8, 128], strides = [1, 1, 1]} : vector<8x8x128xf32> to vector<1x8x128xf32>
    %36 = vector.shape_cast %35 : vector<1x8x128xf32> to vector<8x128xf32>
    %cst_20 = arith.constant dense<0.000000e+00> : vector<8x128xf32>
    %37 = tpu.matmul %34, %2, %cst_20 {dimension_numbers = #tpu.dot_dimension_numbers<[1], [0], [0], [1], [0, 0, 1, 1], [], []>} : vector<8x32xf32>, vector<32x128xf32>, vector<8x128xf32> -> vector<8x128xf32>
    %38 = arith.addf %36, %37 : vector<8x128xf32>
    %39 = arith.negf %38 : vector<8x128xf32>
    %40 = math.exp %39 : vector<8x128xf32>
    %cst_21 = arith.constant 1.000000e+00 : f32
    %41 = vector.broadcast %cst_21 : f32 to vector<8x128xf32>
    %42 = arith.addf %41, %40 : vector<8x128xf32>
    %43 = arith.divf %41, %42 : vector<8x128xf32>
    %44 = math.tanh %38 : vector<8x128xf32>
    %45 = vector.extract_strided_slice %43 {offsets = [0, 0], sizes = [8, 32], strides = [1, 1]} : vector<8x128xf32> to vector<8x32xf32>
    %46 = vector.extract_strided_slice %43 {offsets = [0, 32], sizes = [8, 32], strides = [1, 1]} : vector<8x128xf32> to vector<8x32xf32>
    %47 = vector.extract_strided_slice %43 {offsets = [0, 64], sizes = [8, 32], strides = [1, 1]} : vector<8x128xf32> to vector<8x32xf32>
    %48 = vector.extract_strided_slice %44 {offsets = [0, 96], sizes = [8, 32], strides = [1, 1]} : vector<8x128xf32> to vector<8x32xf32>
    %49 = arith.mulf %46, %32 : vector<8x32xf32>
    %50 = arith.mulf %45, %48 : vector<8x32xf32>
    %51 = arith.addf %49, %50 : vector<8x32xf32>
    %52 = math.tanh %51 : vector<8x32xf32>
    %53 = arith.mulf %47, %52 : vector<8x32xf32>
    %cst_22 = arith.constant dense<0.000000e+00> : vector<8x128xf32>
    %54 = tpu.matmul %34, %1, %cst_22 {dimension_numbers = #tpu.dot_dimension_numbers<[1], [0], [0], [1], [0, 0, 1, 1], [], []>} : vector<8x32xf32>, vector<32x128xf32>, vector<8x128xf32> -> vector<8x128xf32>
    %55 = vector.broadcast %5 : vector<1x128xf32> to vector<8x128xf32>
    %56 = arith.addf %54, %55 : vector<8x128xf32>
    %cst_23 = arith.constant dense<0.000000e+00> : vector<8x128xf32>
    %57 = tpu.matmul %13, %3, %cst_23 {dimension_numbers = #tpu.dot_dimension_numbers<[1], [0], [0], [1], [0, 0, 1, 1], [], []>} : vector<8x32xf32>, vector<32x128xf32>, vector<8x128xf32> -> vector<8x128xf32>
    %58 = arith.addf %56, %57 : vector<8x128xf32>
    %59 = arith.negf %58 : vector<8x128xf32>
    %60 = math.exp %59 : vector<8x128xf32>
    %cst_24 = arith.constant 1.000000e+00 : f32
    %61 = vector.broadcast %cst_24 : f32 to vector<8x128xf32>
    %62 = arith.addf %61, %60 : vector<8x128xf32>
    %63 = arith.divf %61, %62 : vector<8x128xf32>
    %64 = math.tanh %58 : vector<8x128xf32>
    %65 = vector.extract_strided_slice %63 {offsets = [0, 0], sizes = [8, 32], strides = [1, 1]} : vector<8x128xf32> to vector<8x32xf32>
    %66 = vector.extract_strided_slice %63 {offsets = [0, 32], sizes = [8, 32], strides = [1, 1]} : vector<8x128xf32> to vector<8x32xf32>
    %67 = vector.extract_strided_slice %63 {offsets = [0, 64], sizes = [8, 32], strides = [1, 1]} : vector<8x128xf32> to vector<8x32xf32>
    %68 = vector.extract_strided_slice %64 {offsets = [0, 96], sizes = [8, 32], strides = [1, 1]} : vector<8x128xf32> to vector<8x32xf32>
    %69 = arith.mulf %66, %15 : vector<8x32xf32>
    %70 = arith.mulf %65, %68 : vector<8x32xf32>
    %71 = arith.addf %69, %70 : vector<8x32xf32>
    %72 = math.tanh %71 : vector<8x32xf32>
    %73 = arith.mulf %67, %72 : vector<8x32xf32>
    %74 = vector.extract_strided_slice %11 {offsets = [2, 0, 0], sizes = [1, 8, 128], strides = [1, 1, 1]} : vector<8x8x128xf32> to vector<1x8x128xf32>
    %75 = vector.shape_cast %74 : vector<1x8x128xf32> to vector<8x128xf32>
    %cst_25 = arith.constant dense<0.000000e+00> : vector<8x128xf32>
    %76 = tpu.matmul %53, %2, %cst_25 {dimension_numbers = #tpu.dot_dimension_numbers<[1], [0], [0], [1], [0, 0, 1, 1], [], []>} : vector<8x32xf32>, vector<32x128xf32>, vector<8x128xf32> -> vector<8x128xf32>
    %77 = arith.addf %75, %76 : vector<8x128xf32>
    %78 = arith.negf %77 : vector<8x128xf32>
    %79 = math.exp %78 : vector<8x128xf32>
    %cst_26 = arith.constant 1.000000e+00 : f32
    %80 = vector.broadcast %cst_26 : f32 to vector<8x128xf32>
    %81 = arith.addf %80, %79 : vector<8x128xf32>
    %82 = arith.divf %80, %81 : vector<8x128xf32>
    %83 = math.tanh %77 : vector<8x128xf32>
    %84 = vector.extract_strided_slice %82 {offsets = [0, 0], sizes = [8, 32], strides = [1, 1]} : vector<8x128xf32> to vector<8x32xf32>
    %85 = vector.extract_strided_slice %82 {offsets = [0, 32], sizes = [8, 32], strides = [1, 1]} : vector<8x128xf32> to vector<8x32xf32>
    %86 = vector.extract_strided_slice %82 {offsets = [0, 64], sizes = [8, 32], strides = [1, 1]} : vector<8x128xf32> to vector<8x32xf32>
    %87 = vector.extract_strided_slice %83 {offsets = [0, 96], sizes = [8, 32], strides = [1, 1]} : vector<8x128xf32> to vector<8x32xf32>
    %88 = arith.mulf %85, %51 : vector<8x32xf32>
    %89 = arith.mulf %84, %87 : vector<8x32xf32>
    %90 = arith.addf %88, %89 : vector<8x32xf32>
    %91 = math.tanh %90 : vector<8x32xf32>
    %92 = arith.mulf %86, %91 : vector<8x32xf32>
    %cst_27 = arith.constant dense<0.000000e+00> : vector<8x128xf32>
    %93 = tpu.matmul %53, %1, %cst_27 {dimension_numbers = #tpu.dot_dimension_numbers<[1], [0], [0], [1], [0, 0, 1, 1], [], []>} : vector<8x32xf32>, vector<32x128xf32>, vector<8x128xf32> -> vector<8x128xf32>
    %94 = vector.broadcast %5 : vector<1x128xf32> to vector<8x128xf32>
    %95 = arith.addf %93, %94 : vector<8x128xf32>
    %cst_28 = arith.constant dense<0.000000e+00> : vector<8x128xf32>
    %96 = tpu.matmul %73, %3, %cst_28 {dimension_numbers = #tpu.dot_dimension_numbers<[1], [0], [0], [1], [0, 0, 1, 1], [], []>} : vector<8x32xf32>, vector<32x128xf32>, vector<8x128xf32> -> vector<8x128xf32>
    %97 = arith.addf %95, %96 : vector<8x128xf32>
    %98 = arith.negf %97 : vector<8x128xf32>
    %99 = math.exp %98 : vector<8x128xf32>
    %cst_29 = arith.constant 1.000000e+00 : f32
    %100 = vector.broadcast %cst_29 : f32 to vector<8x128xf32>
    %101 = arith.addf %100, %99 : vector<8x128xf32>
    %102 = arith.divf %100, %101 : vector<8x128xf32>
    %103 = math.tanh %97 : vector<8x128xf32>
    %104 = vector.extract_strided_slice %102 {offsets = [0, 0], sizes = [8, 32], strides = [1, 1]} : vector<8x128xf32> to vector<8x32xf32>
    %105 = vector.extract_strided_slice %102 {offsets = [0, 32], sizes = [8, 32], strides = [1, 1]} : vector<8x128xf32> to vector<8x32xf32>
    %106 = vector.extract_strided_slice %102 {offsets = [0, 64], sizes = [8, 32], strides = [1, 1]} : vector<8x128xf32> to vector<8x32xf32>
    %107 = vector.extract_strided_slice %103 {offsets = [0, 96], sizes = [8, 32], strides = [1, 1]} : vector<8x128xf32> to vector<8x32xf32>
    %108 = arith.mulf %105, %71 : vector<8x32xf32>
    %109 = arith.mulf %104, %107 : vector<8x32xf32>
    %110 = arith.addf %108, %109 : vector<8x32xf32>
    %111 = math.tanh %110 : vector<8x32xf32>
    %112 = arith.mulf %106, %111 : vector<8x32xf32>
    %113 = vector.extract_strided_slice %11 {offsets = [3, 0, 0], sizes = [1, 8, 128], strides = [1, 1, 1]} : vector<8x8x128xf32> to vector<1x8x128xf32>
    %114 = vector.shape_cast %113 : vector<1x8x128xf32> to vector<8x128xf32>
    %cst_30 = arith.constant dense<0.000000e+00> : vector<8x128xf32>
    %115 = tpu.matmul %92, %2, %cst_30 {dimension_numbers = #tpu.dot_dimension_numbers<[1], [0], [0], [1], [0, 0, 1, 1], [], []>} : vector<8x32xf32>, vector<32x128xf32>, vector<8x128xf32> -> vector<8x128xf32>
    %116 = arith.addf %114, %115 : vector<8x128xf32>
    %117 = arith.negf %116 : vector<8x128xf32>
    %118 = math.exp %117 : vector<8x128xf32>
    %cst_31 = arith.constant 1.000000e+00 : f32
    %119 = vector.broadcast %cst_31 : f32 to vector<8x128xf32>
    %120 = arith.addf %119, %118 : vector<8x128xf32>
    %121 = arith.divf %119, %120 : vector<8x128xf32>
    %122 = math.tanh %116 : vector<8x128xf32>
    %123 = vector.extract_strided_slice %121 {offsets = [0, 0], sizes = [8, 32], strides = [1, 1]} : vector<8x128xf32> to vector<8x32xf32>
    %124 = vector.extract_strided_slice %121 {offsets = [0, 32], sizes = [8, 32], strides = [1, 1]} : vector<8x128xf32> to vector<8x32xf32>
    %125 = vector.extract_strided_slice %121 {offsets = [0, 64], sizes = [8, 32], strides = [1, 1]} : vector<8x128xf32> to vector<8x32xf32>
    %126 = vector.extract_strided_slice %122 {offsets = [0, 96], sizes = [8, 32], strides = [1, 1]} : vector<8x128xf32> to vector<8x32xf32>
    %127 = arith.mulf %124, %90 : vector<8x32xf32>
    %128 = arith.mulf %123, %126 : vector<8x32xf32>
    %129 = arith.addf %127, %128 : vector<8x32xf32>
    %130 = math.tanh %129 : vector<8x32xf32>
    %131 = arith.mulf %125, %130 : vector<8x32xf32>
    %cst_32 = arith.constant dense<0.000000e+00> : vector<8x128xf32>
    %132 = tpu.matmul %92, %1, %cst_32 {dimension_numbers = #tpu.dot_dimension_numbers<[1], [0], [0], [1], [0, 0, 1, 1], [], []>} : vector<8x32xf32>, vector<32x128xf32>, vector<8x128xf32> -> vector<8x128xf32>
    %133 = vector.broadcast %5 : vector<1x128xf32> to vector<8x128xf32>
    %134 = arith.addf %132, %133 : vector<8x128xf32>
    %cst_33 = arith.constant dense<0.000000e+00> : vector<8x128xf32>
    %135 = tpu.matmul %112, %3, %cst_33 {dimension_numbers = #tpu.dot_dimension_numbers<[1], [0], [0], [1], [0, 0, 1, 1], [], []>} : vector<8x32xf32>, vector<32x128xf32>, vector<8x128xf32> -> vector<8x128xf32>
    %136 = arith.addf %134, %135 : vector<8x128xf32>
    %137 = arith.negf %136 : vector<8x128xf32>
    %138 = math.exp %137 : vector<8x128xf32>
    %cst_34 = arith.constant 1.000000e+00 : f32
    %139 = vector.broadcast %cst_34 : f32 to vector<8x128xf32>
    %140 = arith.addf %139, %138 : vector<8x128xf32>
    %141 = arith.divf %139, %140 : vector<8x128xf32>
    %142 = math.tanh %136 : vector<8x128xf32>
    %143 = vector.extract_strided_slice %141 {offsets = [0, 0], sizes = [8, 32], strides = [1, 1]} : vector<8x128xf32> to vector<8x32xf32>
    %144 = vector.extract_strided_slice %141 {offsets = [0, 32], sizes = [8, 32], strides = [1, 1]} : vector<8x128xf32> to vector<8x32xf32>
    %145 = vector.extract_strided_slice %141 {offsets = [0, 64], sizes = [8, 32], strides = [1, 1]} : vector<8x128xf32> to vector<8x32xf32>
    %146 = vector.extract_strided_slice %142 {offsets = [0, 96], sizes = [8, 32], strides = [1, 1]} : vector<8x128xf32> to vector<8x32xf32>
    %147 = arith.mulf %144, %110 : vector<8x32xf32>
    %148 = arith.mulf %143, %146 : vector<8x32xf32>
    %149 = arith.addf %147, %148 : vector<8x32xf32>
    %150 = math.tanh %149 : vector<8x32xf32>
    %151 = arith.mulf %145, %150 : vector<8x32xf32>
    %152 = vector.extract_strided_slice %11 {offsets = [4, 0, 0], sizes = [1, 8, 128], strides = [1, 1, 1]} : vector<8x8x128xf32> to vector<1x8x128xf32>
    %153 = vector.shape_cast %152 : vector<1x8x128xf32> to vector<8x128xf32>
    %cst_35 = arith.constant dense<0.000000e+00> : vector<8x128xf32>
    %154 = tpu.matmul %131, %2, %cst_35 {dimension_numbers = #tpu.dot_dimension_numbers<[1], [0], [0], [1], [0, 0, 1, 1], [], []>} : vector<8x32xf32>, vector<32x128xf32>, vector<8x128xf32> -> vector<8x128xf32>
    %155 = arith.addf %153, %154 : vector<8x128xf32>
    %156 = arith.negf %155 : vector<8x128xf32>
    %157 = math.exp %156 : vector<8x128xf32>
    %cst_36 = arith.constant 1.000000e+00 : f32
    %158 = vector.broadcast %cst_36 : f32 to vector<8x128xf32>
    %159 = arith.addf %158, %157 : vector<8x128xf32>
    %160 = arith.divf %158, %159 : vector<8x128xf32>
    %161 = math.tanh %155 : vector<8x128xf32>
    %162 = vector.extract_strided_slice %160 {offsets = [0, 0], sizes = [8, 32], strides = [1, 1]} : vector<8x128xf32> to vector<8x32xf32>
    %163 = vector.extract_strided_slice %160 {offsets = [0, 32], sizes = [8, 32], strides = [1, 1]} : vector<8x128xf32> to vector<8x32xf32>
    %164 = vector.extract_strided_slice %160 {offsets = [0, 64], sizes = [8, 32], strides = [1, 1]} : vector<8x128xf32> to vector<8x32xf32>
    %165 = vector.extract_strided_slice %161 {offsets = [0, 96], sizes = [8, 32], strides = [1, 1]} : vector<8x128xf32> to vector<8x32xf32>
    %166 = arith.mulf %163, %129 : vector<8x32xf32>
    %167 = arith.mulf %162, %165 : vector<8x32xf32>
    %168 = arith.addf %166, %167 : vector<8x32xf32>
    %169 = math.tanh %168 : vector<8x32xf32>
    %170 = arith.mulf %164, %169 : vector<8x32xf32>
    %cst_37 = arith.constant dense<0.000000e+00> : vector<8x128xf32>
    %171 = tpu.matmul %131, %1, %cst_37 {dimension_numbers = #tpu.dot_dimension_numbers<[1], [0], [0], [1], [0, 0, 1, 1], [], []>} : vector<8x32xf32>, vector<32x128xf32>, vector<8x128xf32> -> vector<8x128xf32>
    %172 = vector.broadcast %5 : vector<1x128xf32> to vector<8x128xf32>
    %173 = arith.addf %171, %172 : vector<8x128xf32>
    %cst_38 = arith.constant dense<0.000000e+00> : vector<8x128xf32>
    %174 = tpu.matmul %151, %3, %cst_38 {dimension_numbers = #tpu.dot_dimension_numbers<[1], [0], [0], [1], [0, 0, 1, 1], [], []>} : vector<8x32xf32>, vector<32x128xf32>, vector<8x128xf32> -> vector<8x128xf32>
    %175 = arith.addf %173, %174 : vector<8x128xf32>
    %176 = arith.negf %175 : vector<8x128xf32>
    %177 = math.exp %176 : vector<8x128xf32>
    %cst_39 = arith.constant 1.000000e+00 : f32
    %178 = vector.broadcast %cst_39 : f32 to vector<8x128xf32>
    %179 = arith.addf %178, %177 : vector<8x128xf32>
    %180 = arith.divf %178, %179 : vector<8x128xf32>
    %181 = math.tanh %175 : vector<8x128xf32>
    %182 = vector.extract_strided_slice %180 {offsets = [0, 0], sizes = [8, 32], strides = [1, 1]} : vector<8x128xf32> to vector<8x32xf32>
    %183 = vector.extract_strided_slice %180 {offsets = [0, 32], sizes = [8, 32], strides = [1, 1]} : vector<8x128xf32> to vector<8x32xf32>
    %184 = vector.extract_strided_slice %180 {offsets = [0, 64], sizes = [8, 32], strides = [1, 1]} : vector<8x128xf32> to vector<8x32xf32>
    %185 = vector.extract_strided_slice %181 {offsets = [0, 96], sizes = [8, 32], strides = [1, 1]} : vector<8x128xf32> to vector<8x32xf32>
    %186 = arith.mulf %183, %149 : vector<8x32xf32>
    %187 = arith.mulf %182, %185 : vector<8x32xf32>
    %188 = arith.addf %186, %187 : vector<8x32xf32>
    %189 = math.tanh %188 : vector<8x32xf32>
    %190 = arith.mulf %184, %189 : vector<8x32xf32>
    %191 = vector.extract_strided_slice %11 {offsets = [5, 0, 0], sizes = [1, 8, 128], strides = [1, 1, 1]} : vector<8x8x128xf32> to vector<1x8x128xf32>
    %192 = vector.shape_cast %191 : vector<1x8x128xf32> to vector<8x128xf32>
    %cst_40 = arith.constant dense<0.000000e+00> : vector<8x128xf32>
    %193 = tpu.matmul %170, %2, %cst_40 {dimension_numbers = #tpu.dot_dimension_numbers<[1], [0], [0], [1], [0, 0, 1, 1], [], []>} : vector<8x32xf32>, vector<32x128xf32>, vector<8x128xf32> -> vector<8x128xf32>
    %194 = arith.addf %192, %193 : vector<8x128xf32>
    %195 = arith.negf %194 : vector<8x128xf32>
    %196 = math.exp %195 : vector<8x128xf32>
    %cst_41 = arith.constant 1.000000e+00 : f32
    %197 = vector.broadcast %cst_41 : f32 to vector<8x128xf32>
    %198 = arith.addf %197, %196 : vector<8x128xf32>
    %199 = arith.divf %197, %198 : vector<8x128xf32>
    %200 = math.tanh %194 : vector<8x128xf32>
    %201 = vector.extract_strided_slice %199 {offsets = [0, 0], sizes = [8, 32], strides = [1, 1]} : vector<8x128xf32> to vector<8x32xf32>
    %202 = vector.extract_strided_slice %199 {offsets = [0, 32], sizes = [8, 32], strides = [1, 1]} : vector<8x128xf32> to vector<8x32xf32>
    %203 = vector.extract_strided_slice %199 {offsets = [0, 64], sizes = [8, 32], strides = [1, 1]} : vector<8x128xf32> to vector<8x32xf32>
    %204 = vector.extract_strided_slice %200 {offsets = [0, 96], sizes = [8, 32], strides = [1, 1]} : vector<8x128xf32> to vector<8x32xf32>
    %205 = arith.mulf %202, %168 : vector<8x32xf32>
    %206 = arith.mulf %201, %204 : vector<8x32xf32>
    %207 = arith.addf %205, %206 : vector<8x32xf32>
    %208 = math.tanh %207 : vector<8x32xf32>
    %209 = arith.mulf %203, %208 : vector<8x32xf32>
    %cst_42 = arith.constant dense<0.000000e+00> : vector<8x128xf32>
    %210 = tpu.matmul %170, %1, %cst_42 {dimension_numbers = #tpu.dot_dimension_numbers<[1], [0], [0], [1], [0, 0, 1, 1], [], []>} : vector<8x32xf32>, vector<32x128xf32>, vector<8x128xf32> -> vector<8x128xf32>
    %211 = vector.broadcast %5 : vector<1x128xf32> to vector<8x128xf32>
    %212 = arith.addf %210, %211 : vector<8x128xf32>
    %cst_43 = arith.constant dense<0.000000e+00> : vector<8x128xf32>
    %213 = tpu.matmul %190, %3, %cst_43 {dimension_numbers = #tpu.dot_dimension_numbers<[1], [0], [0], [1], [0, 0, 1, 1], [], []>} : vector<8x32xf32>, vector<32x128xf32>, vector<8x128xf32> -> vector<8x128xf32>
    %214 = arith.addf %212, %213 : vector<8x128xf32>
    %215 = arith.negf %214 : vector<8x128xf32>
    %216 = math.exp %215 : vector<8x128xf32>
    %cst_44 = arith.constant 1.000000e+00 : f32
    %217 = vector.broadcast %cst_44 : f32 to vector<8x128xf32>
    %218 = arith.addf %217, %216 : vector<8x128xf32>
    %219 = arith.divf %217, %218 : vector<8x128xf32>
    %220 = math.tanh %214 : vector<8x128xf32>
    %221 = vector.extract_strided_slice %219 {offsets = [0, 0], sizes = [8, 32], strides = [1, 1]} : vector<8x128xf32> to vector<8x32xf32>
    %222 = vector.extract_strided_slice %219 {offsets = [0, 32], sizes = [8, 32], strides = [1, 1]} : vector<8x128xf32> to vector<8x32xf32>
    %223 = vector.extract_strided_slice %219 {offsets = [0, 64], sizes = [8, 32], strides = [1, 1]} : vector<8x128xf32> to vector<8x32xf32>
    %224 = vector.extract_strided_slice %220 {offsets = [0, 96], sizes = [8, 32], strides = [1, 1]} : vector<8x128xf32> to vector<8x32xf32>
    %225 = arith.mulf %222, %188 : vector<8x32xf32>
    %226 = arith.mulf %221, %224 : vector<8x32xf32>
    %227 = arith.addf %225, %226 : vector<8x32xf32>
    %228 = math.tanh %227 : vector<8x32xf32>
    %229 = arith.mulf %223, %228 : vector<8x32xf32>
    %230 = vector.extract_strided_slice %11 {offsets = [6, 0, 0], sizes = [1, 8, 128], strides = [1, 1, 1]} : vector<8x8x128xf32> to vector<1x8x128xf32>
    %231 = vector.shape_cast %230 : vector<1x8x128xf32> to vector<8x128xf32>
    %cst_45 = arith.constant dense<0.000000e+00> : vector<8x128xf32>
    %232 = tpu.matmul %209, %2, %cst_45 {dimension_numbers = #tpu.dot_dimension_numbers<[1], [0], [0], [1], [0, 0, 1, 1], [], []>} : vector<8x32xf32>, vector<32x128xf32>, vector<8x128xf32> -> vector<8x128xf32>
    %233 = arith.addf %231, %232 : vector<8x128xf32>
    %234 = arith.negf %233 : vector<8x128xf32>
    %235 = math.exp %234 : vector<8x128xf32>
    %cst_46 = arith.constant 1.000000e+00 : f32
    %236 = vector.broadcast %cst_46 : f32 to vector<8x128xf32>
    %237 = arith.addf %236, %235 : vector<8x128xf32>
    %238 = arith.divf %236, %237 : vector<8x128xf32>
    %239 = math.tanh %233 : vector<8x128xf32>
    %240 = vector.extract_strided_slice %238 {offsets = [0, 0], sizes = [8, 32], strides = [1, 1]} : vector<8x128xf32> to vector<8x32xf32>
    %241 = vector.extract_strided_slice %238 {offsets = [0, 32], sizes = [8, 32], strides = [1, 1]} : vector<8x128xf32> to vector<8x32xf32>
    %242 = vector.extract_strided_slice %238 {offsets = [0, 64], sizes = [8, 32], strides = [1, 1]} : vector<8x128xf32> to vector<8x32xf32>
    %243 = vector.extract_strided_slice %239 {offsets = [0, 96], sizes = [8, 32], strides = [1, 1]} : vector<8x128xf32> to vector<8x32xf32>
    %244 = arith.mulf %241, %207 : vector<8x32xf32>
    %245 = arith.mulf %240, %243 : vector<8x32xf32>
    %246 = arith.addf %244, %245 : vector<8x32xf32>
    %247 = math.tanh %246 : vector<8x32xf32>
    %248 = arith.mulf %242, %247 : vector<8x32xf32>
    %cst_47 = arith.constant dense<0.000000e+00> : vector<8x128xf32>
    %249 = tpu.matmul %209, %1, %cst_47 {dimension_numbers = #tpu.dot_dimension_numbers<[1], [0], [0], [1], [0, 0, 1, 1], [], []>} : vector<8x32xf32>, vector<32x128xf32>, vector<8x128xf32> -> vector<8x128xf32>
    %250 = vector.broadcast %5 : vector<1x128xf32> to vector<8x128xf32>
    %251 = arith.addf %249, %250 : vector<8x128xf32>
    %cst_48 = arith.constant dense<0.000000e+00> : vector<8x128xf32>
    %252 = tpu.matmul %229, %3, %cst_48 {dimension_numbers = #tpu.dot_dimension_numbers<[1], [0], [0], [1], [0, 0, 1, 1], [], []>} : vector<8x32xf32>, vector<32x128xf32>, vector<8x128xf32> -> vector<8x128xf32>
    %253 = arith.addf %251, %252 : vector<8x128xf32>
    %254 = arith.negf %253 : vector<8x128xf32>
    %255 = math.exp %254 : vector<8x128xf32>
    %cst_49 = arith.constant 1.000000e+00 : f32
    %256 = vector.broadcast %cst_49 : f32 to vector<8x128xf32>
    %257 = arith.addf %256, %255 : vector<8x128xf32>
    %258 = arith.divf %256, %257 : vector<8x128xf32>
    %259 = math.tanh %253 : vector<8x128xf32>
    %260 = vector.extract_strided_slice %258 {offsets = [0, 0], sizes = [8, 32], strides = [1, 1]} : vector<8x128xf32> to vector<8x32xf32>
    %261 = vector.extract_strided_slice %258 {offsets = [0, 32], sizes = [8, 32], strides = [1, 1]} : vector<8x128xf32> to vector<8x32xf32>
    %262 = vector.extract_strided_slice %258 {offsets = [0, 64], sizes = [8, 32], strides = [1, 1]} : vector<8x128xf32> to vector<8x32xf32>
    %263 = vector.extract_strided_slice %259 {offsets = [0, 96], sizes = [8, 32], strides = [1, 1]} : vector<8x128xf32> to vector<8x32xf32>
    %264 = arith.mulf %261, %227 : vector<8x32xf32>
    %265 = arith.mulf %260, %263 : vector<8x32xf32>
    %266 = arith.addf %264, %265 : vector<8x32xf32>
    %267 = math.tanh %266 : vector<8x32xf32>
    %268 = arith.mulf %262, %267 : vector<8x32xf32>
    %269 = vector.extract_strided_slice %11 {offsets = [7, 0, 0], sizes = [1, 8, 128], strides = [1, 1, 1]} : vector<8x8x128xf32> to vector<1x8x128xf32>
    %270 = vector.shape_cast %269 : vector<1x8x128xf32> to vector<8x128xf32>
    %cst_50 = arith.constant dense<0.000000e+00> : vector<8x128xf32>
    %271 = tpu.matmul %248, %2, %cst_50 {dimension_numbers = #tpu.dot_dimension_numbers<[1], [0], [0], [1], [0, 0, 1, 1], [], []>} : vector<8x32xf32>, vector<32x128xf32>, vector<8x128xf32> -> vector<8x128xf32>
    %272 = arith.addf %270, %271 : vector<8x128xf32>
    %273 = arith.negf %272 : vector<8x128xf32>
    %274 = math.exp %273 : vector<8x128xf32>
    %cst_51 = arith.constant 1.000000e+00 : f32
    %275 = vector.broadcast %cst_51 : f32 to vector<8x128xf32>
    %276 = arith.addf %275, %274 : vector<8x128xf32>
    %277 = arith.divf %275, %276 : vector<8x128xf32>
    %278 = math.tanh %272 : vector<8x128xf32>
    %279 = vector.extract_strided_slice %277 {offsets = [0, 0], sizes = [8, 32], strides = [1, 1]} : vector<8x128xf32> to vector<8x32xf32>
    %280 = vector.extract_strided_slice %277 {offsets = [0, 32], sizes = [8, 32], strides = [1, 1]} : vector<8x128xf32> to vector<8x32xf32>
    %281 = vector.extract_strided_slice %277 {offsets = [0, 64], sizes = [8, 32], strides = [1, 1]} : vector<8x128xf32> to vector<8x32xf32>
    %282 = vector.extract_strided_slice %278 {offsets = [0, 96], sizes = [8, 32], strides = [1, 1]} : vector<8x128xf32> to vector<8x32xf32>
    %283 = arith.mulf %280, %246 : vector<8x32xf32>
    %284 = arith.mulf %279, %282 : vector<8x32xf32>
    %285 = arith.addf %283, %284 : vector<8x32xf32>
    %286 = math.tanh %285 : vector<8x32xf32>
    %287 = arith.mulf %281, %286 : vector<8x32xf32>
    %cst_52 = arith.constant dense<0.000000e+00> : vector<8x128xf32>
    %288 = tpu.matmul %248, %1, %cst_52 {dimension_numbers = #tpu.dot_dimension_numbers<[1], [0], [0], [1], [0, 0, 1, 1], [], []>} : vector<8x32xf32>, vector<32x128xf32>, vector<8x128xf32> -> vector<8x128xf32>
    %289 = vector.broadcast %5 : vector<1x128xf32> to vector<8x128xf32>
    %290 = arith.addf %288, %289 : vector<8x128xf32>
    %cst_53 = arith.constant dense<0.000000e+00> : vector<8x128xf32>
    %291 = tpu.matmul %268, %3, %cst_53 {dimension_numbers = #tpu.dot_dimension_numbers<[1], [0], [0], [1], [0, 0, 1, 1], [], []>} : vector<8x32xf32>, vector<32x128xf32>, vector<8x128xf32> -> vector<8x128xf32>
    %292 = arith.addf %290, %291 : vector<8x128xf32>
    %293 = arith.negf %292 : vector<8x128xf32>
    %294 = math.exp %293 : vector<8x128xf32>
    %cst_54 = arith.constant 1.000000e+00 : f32
    %295 = vector.broadcast %cst_54 : f32 to vector<8x128xf32>
    %296 = arith.addf %295, %294 : vector<8x128xf32>
    %297 = arith.divf %295, %296 : vector<8x128xf32>
    %298 = math.tanh %292 : vector<8x128xf32>
    %299 = vector.extract_strided_slice %297 {offsets = [0, 0], sizes = [8, 32], strides = [1, 1]} : vector<8x128xf32> to vector<8x32xf32>
    %300 = vector.extract_strided_slice %297 {offsets = [0, 32], sizes = [8, 32], strides = [1, 1]} : vector<8x128xf32> to vector<8x32xf32>
    %301 = vector.extract_strided_slice %297 {offsets = [0, 64], sizes = [8, 32], strides = [1, 1]} : vector<8x128xf32> to vector<8x32xf32>
    %302 = vector.extract_strided_slice %298 {offsets = [0, 96], sizes = [8, 32], strides = [1, 1]} : vector<8x128xf32> to vector<8x32xf32>
    %303 = arith.mulf %300, %266 : vector<8x32xf32>
    %304 = arith.mulf %299, %302 : vector<8x32xf32>
    %305 = arith.addf %303, %304 : vector<8x32xf32>
    %306 = math.tanh %305 : vector<8x32xf32>
    %307 = arith.mulf %301, %306 : vector<8x32xf32>
    %cst_55 = arith.constant dense<0.000000e+00> : vector<8x128xf32>
    %308 = tpu.matmul %287, %1, %cst_55 {dimension_numbers = #tpu.dot_dimension_numbers<[1], [0], [0], [1], [0, 0, 1, 1], [], []>} : vector<8x32xf32>, vector<32x128xf32>, vector<8x128xf32> -> vector<8x128xf32>
    %309 = vector.broadcast %5 : vector<1x128xf32> to vector<8x128xf32>
    %310 = arith.addf %308, %309 : vector<8x128xf32>
    %cst_56 = arith.constant dense<0.000000e+00> : vector<8x128xf32>
    %311 = tpu.matmul %307, %3, %cst_56 {dimension_numbers = #tpu.dot_dimension_numbers<[1], [0], [0], [1], [0, 0, 1, 1], [], []>} : vector<8x32xf32>, vector<32x128xf32>, vector<8x128xf32> -> vector<8x128xf32>
    %312 = arith.addf %310, %311 : vector<8x128xf32>
    %313 = arith.negf %312 : vector<8x128xf32>
    %314 = math.exp %313 : vector<8x128xf32>
    %cst_57 = arith.constant 1.000000e+00 : f32
    %315 = vector.broadcast %cst_57 : f32 to vector<8x128xf32>
    %316 = arith.addf %315, %314 : vector<8x128xf32>
    %317 = arith.divf %315, %316 : vector<8x128xf32>
    %318 = math.tanh %312 : vector<8x128xf32>
    %319 = vector.extract_strided_slice %317 {offsets = [0, 0], sizes = [8, 32], strides = [1, 1]} : vector<8x128xf32> to vector<8x32xf32>
    %320 = vector.extract_strided_slice %317 {offsets = [0, 32], sizes = [8, 32], strides = [1, 1]} : vector<8x128xf32> to vector<8x32xf32>
    %321 = vector.extract_strided_slice %317 {offsets = [0, 64], sizes = [8, 32], strides = [1, 1]} : vector<8x128xf32> to vector<8x32xf32>
    %322 = vector.extract_strided_slice %318 {offsets = [0, 96], sizes = [8, 32], strides = [1, 1]} : vector<8x128xf32> to vector<8x32xf32>
    %323 = arith.mulf %320, %305 : vector<8x32xf32>
    %324 = arith.mulf %319, %322 : vector<8x32xf32>
    %325 = arith.addf %323, %324 : vector<8x32xf32>
    %326 = math.tanh %325 : vector<8x32xf32>
    %327 = arith.mulf %321, %326 : vector<8x32xf32>
    %c0_58 = arith.constant 0 : index
    %c0_59 = arith.constant 0 : index
    %328 = vector.load %arg8[%c0_58, %c0_59] : memref<32x1xf32, #tpu.memory_space<vmem>>, vector<32x1xf32>
    %cst_60 = arith.constant dense<0.000000e+00> : vector<8x1xf32>
    %329 = tpu.matmul %327, %328, %cst_60 {dimension_numbers = #tpu.dot_dimension_numbers<[1], [0], [0], [1], [0, 0, 1, 1], [], []>} : vector<8x32xf32>, vector<32x1xf32>, vector<8x1xf32> -> vector<8x1xf32>
    %c0_61 = arith.constant 0 : index
    %c0_62 = arith.constant 0 : index
    %330 = vector.load %arg9[%c0_61, %c0_62] : memref<1x1xf32, #tpu.memory_space<vmem>>, vector<1x1xf32>
    %331 = vector.broadcast %330 : vector<1x1xf32> to vector<8x1xf32>
    %332 = arith.addf %329, %331 : vector<8x1xf32>
    %c0_63 = arith.constant 0 : index
    %c0_64 = arith.constant 0 : index
    %333 = vector.load %arg10[%c0_63, %c0_64] : memref<8x1xf32, #tpu.memory_space<vmem>>, vector<8x1xf32>
    tpu.vector_store %arg10[%c0_63, %c0_64], %332 {strides = array<i32>} : memref<8x1xf32, #tpu.memory_space<vmem>>, vector<8x1xf32>,
    return
  }
  func.func @transform_0(%arg0: i32) -> (i32, i32, i32) {
    %c0_i32 = arith.constant 0 : i32
    %c0_i32_0 = arith.constant 0 : i32
    %c0_i32_1 = arith.constant 0 : i32
    return %c0_i32, %arg0, %c0_i32_0 : i32, i32, i32
  }
  func.func @transform_1(%arg0: i32) -> (i32, i32) {
    %c0_i32 = arith.constant 0 : i32
    %c0_i32_0 = arith.constant 0 : i32
    %c0_i32_1 = arith.constant 0 : i32
    return %c0_i32, %c0_i32_0 : i32, i32
  }
  func.func @transform_2(%arg0: i32) -> (i32, i32) {
    %c0_i32 = arith.constant 0 : i32
    %c0_i32_0 = arith.constant 0 : i32
    %c0_i32_1 = arith.constant 0 : i32
    return %c0_i32, %c0_i32_0 : i32, i32
  }
  func.func @transform_3(%arg0: i32) -> (i32, i32) {
    %c0_i32 = arith.constant 0 : i32
    %c0_i32_0 = arith.constant 0 : i32
    %c0_i32_1 = arith.constant 0 : i32
    return %c0_i32, %c0_i32_0 : i32, i32
  }
  func.func @transform_4(%arg0: i32) -> (i32, i32) {
    %c0_i32 = arith.constant 0 : i32
    %c0_i32_0 = arith.constant 0 : i32
    %c0_i32_1 = arith.constant 0 : i32
    return %c0_i32, %c0_i32_0 : i32, i32
  }
  func.func @transform_5(%arg0: i32) -> (i32, i32) {
    %c0_i32 = arith.constant 0 : i32
    %c0_i32_0 = arith.constant 0 : i32
    %c0_i32_1 = arith.constant 0 : i32
    return %c0_i32, %c0_i32_0 : i32, i32
  }
  func.func @transform_6(%arg0: i32) -> (i32, i32) {
    %c0_i32 = arith.constant 0 : i32
    %c0_i32_0 = arith.constant 0 : i32
    %c0_i32_1 = arith.constant 0 : i32
    return %c0_i32, %c0_i32_0 : i32, i32
  }
  func.func @transform_7(%arg0: i32) -> (i32, i32) {
    %c0_i32 = arith.constant 0 : i32
    %c0_i32_0 = arith.constant 0 : i32
    %c0_i32_1 = arith.constant 0 : i32
    return %c0_i32, %c0_i32_0 : i32, i32
  }
  func.func @transform_8(%arg0: i32) -> (i32, i32) {
    %c0_i32 = arith.constant 0 : i32
    %c0_i32_0 = arith.constant 0 : i32
    %c0_i32_1 = arith.constant 0 : i32
    return %c0_i32, %c0_i32_0 : i32, i32
  }
  func.func @transform_9(%arg0: i32) -> (i32, i32) {
    %c0_i32 = arith.constant 0 : i32
    %c0_i32_0 = arith.constant 0 : i32
    return %arg0, %c0_i32 : i32, i32
  }
}

</mosaic_0001>

<bundles_post_ra>
// kernel: lstm_model_forward.1
= control target key start
LH: loop header
LB: loop body
LE: loop exit
PB: predicated region body
PF: predicated region fallthrough
CT: control target
= control target key end

     0   :  { %vm88_vm0 = vcmask 1043456   ;;  %vm63_vm1 = vcmask 31744   ;;  %v3235_v0 = vmov 0.0|0.0   ;;  %vm3236_vm2 = vmmov 0   ;;  %s3238_s23 = smov 32   ;;  %s3729_s2 = inlined_call_operand.vmem [shape: f32[32,128], index: 2, kind: input, shape index: {}]   ;;  %s3730_s1 = inlined_call_operand.vmem [shape: f32[4,128], index: 1, kind: input, shape index: {}]   ;;  %s3731_s0 = inlined_call_operand.vmem [shape: f32[8,8,4], index: 0, kind: input, shape index: {}]   ;;  %s3732_s3 = inlined_call_operand.vmem [shape: f32[1,128], index: 3, kind: input, shape index: {}]   ;;  %s3733_s4 = inlined_call_operand.vmem [shape: f32[32,128], index: 4, kind: input, shape index: {}]   ;;  %s3734_s5 = inlined_call_operand.vmem [shape: f32[32,128], index: 5, kind: input, shape index: {}]   ;;  %s3735_s6 = inlined_call_operand.vmem [shape: f32[1,128], index: 6, kind: input, shape index: {}]   ;;  %s3736_s7 = inlined_call_operand.vmem [shape: f32[32,1], index: 7, kind: input, shape index: {}]   ;;  %s3737_s8 = inlined_call_operand.<no memory space> [shape: f32[1,1], index: 8, kind: input, shape index: {}]   ;;  %s3738_s9 = inlined_call_operand.vmem [shape: f32[8,1], index: 9, kind: output, shape index: {}]  }
   0x1   :  { %2928 = vmatprep.subr.bf16.mxu1 %v3235_v0  ;;  %v39_v1 = vld [vmem:[%s3729_s2] sm:$0xff]  ;;  %v40_v2 = vld [vmem:[%s3729_s2 + $0x8] sm:$0xff]  ;;  %v41_v7 = vld [vmem:[%s3729_s2 + $0x10] sm:$0xff]  ;;  %v3237_v8 = vmov 0.0   ;;  %vm197_vm3 = vcmask 261120   ;;  %vm2448_vm4 = vcmask 7168  }
   0x2   :  { %v34_v3 = vld [vmem:[%s3730_s1] sm:$0xf]  ;;  %v3300_v4 = vpack.c.bf16 %v40_v2, %v39_v1  ;;  %v50_v6 = vld [vmem:[%s3731_s0 + $0x8] sm:$0xff]  ;;  %2661 = vmatprep.mubr.msk.f32.mxu1 %vm3236_vm2, %v3237_v8  ;;  %v42_v9 = vld [vmem:[%s3729_s2 + $0x18] sm:$0xff] }
   0x3   :  { %2639 = vmatprep.subr.msk.mxu0 %vm88_vm0, %v34_v3  ;;  %v49_v5 = vld [vmem:[%s3731_s0] sm:$0xff]  ;;  %v3321_v10 = vpack.c.bf16 %v42_v9, %v41_v7  ;;  %v51_v28 = vld [vmem:[%s3731_s0 + $0x10] sm:$0xff]  ;;  %v52_v29 = vld [vmem:[%s3731_s0 + $0x18] sm:$0xff] }
   0x4   :  { %2640 = vmatpush3.msk.msra.mxu0 %vm88_vm0, %v34_v3  ;;  %2641 = vmatprep.mubr.msk.f32.mxu0 %vm63_vm1, %v49_v5  ;;  %v3339_v12 = vld [vmem:[%s3732_s3] ss:$0 sm:$0xff]  ;;  %v36_v32 = vld [vmem:[%s3733_s4 + $0x8] sm:$0xff]  ;;  %v37_v34 = vld [vmem:[%s3733_s4 + $0x10] sm:$0xff] }
   0x5   :  { %2930 = vmatpush3.bf16.msra.mxu1 %v3300_v4  ;;  %2642 = vmatmul.mubr.msk.f32.vlgmr.msra.gmra.mrb[0].mxu0 %vm63_vm1, %v50_v6  ;;  %v53_v30 = vld [vmem:[%s3731_s0 + $0x20] sm:$0xff]  ;;  %v54_v35 = vld [vmem:[%s3731_s0 + $0x28] sm:$0xff]  ;;  %v38_v36 = vld [vmem:[%s3733_s4 + $0x18] sm:$0xff] }
   0x6   :  { %2931 = vmatprep.subr.bf16.mxu1 %v3235_v0  ;;  %2940 = vmatprep.subr.bf16.mxu0 %v3235_v0  ;;  %v35_v31 = vld [vmem:[%s3733_s4] sm:$0xff]  ;;  %v55_v37 = vld [vmem:[%s3731_s0 + $0x30] sm:$0xff]  ;;  %v3380_v38 = vpack.c.bf16 %v38_v36, %v37_v34  ;;  %v56_v39 = vld [vmem:[%s3731_s0 + $0x38] sm:$0xff]  ;;  %s3239_s4 = smov 64  }
   0x7   :  { %2644 = vmatprep.mubr.msk.f32.mxu0 %vm63_vm1, %v51_v28  ;;  %v3364_v33 = vpack.c.bf16 %v36_v32, %v35_v31  ;;  %v43_v47 = vld [vmem:[%s3734_s5] sm:$0xff]  ;;  %v44_v48 = vld [vmem:[%s3734_s5 + $0x8] sm:$0xff]  ;;  %v45_v50 = vld [vmem:[%s3734_s5 + $0x10] sm:$0xff] }
   0x8   :  { %v3409_v49 = vpack.c.bf16 %v44_v48, %v43_v47  ;;  %v46_v51 = vld [vmem:[%s3734_s5 + $0x18] sm:$0xff]  ;;  %v3449_v60 = vld [vmem:[%s3735_s6] ss:$0 sm:$0xff] }
   0x9   :  { %2933 = vmatpush3.bf16.msra.mxu1 %v3321_v10  ;;  %2645 = vmatmul.mubr.msk.f32.gmra.mrb[2].mxu0 %vm63_vm1, %v52_v29  ;;  %v3420_v53 = vpack.c.bf16 %v46_v51, %v45_v50 }
   0xa   :  { %2934 = vmatprep.subr.bf16.mxu1 %v3235_v0  ;;  %2647 = vmatprep.mubr.msk.f32.mxu0 %vm63_vm1, %v53_v30 }
   0xb   :  { %2942 = vmatpush3.bf16.msra.mxu0 %v3364_v33 }
   0xc   :  { %2662 = vmatmul.mubr.f32.vlgmr.msra.gmra.mrb[0].mxu1 %v3237_v8  ;;  %2943 = vmatprep.subr.bf16.mxu0 %v3235_v0 }
   0xd   :  { %2936 = vmatpush3.bf16.msra.mxu1 %v3300_v4  ;;  %2672 = vmatprep.mubr.msk.f32.mxu1 %vm3236_vm2, %v3237_v8 }
   0xe   :  { %2937 = vmatprep.subr.bf16.mxu1 %v3235_v0  ;;  %2648 = vmatmul.mubr.msk.f32.gmra.mrb[4].mxu0 %vm63_vm1, %v54_v35 }
   0xf   :  { %2650 = vmatprep.mubr.msk.f32.mxu0 %vm63_vm1, %v55_v37  ;;  %2945 = vmatpush3.bf16.msra.mxu0 %v3380_v38 }
  0x10   :  { %2946 = vmatprep.subr.bf16.mxu0 %v3235_v0 }
  0x11   :  { %2939 = vmatpush3.bf16.msra.mxu1 %v3321_v10 }
  0x12   :  { %2952 = vmatprep.subr.bf16.mxu1 %v3235_v0  ;;  %2651 = vmatmul.mubr.msk.f32.gmra.mrb[6].mxu0 %vm63_vm1, %v56_v39 }
  0x13   :  { %2683 = vmatprep.mubr.msk.f32.mxu0 %vm3236_vm2, %v3237_v8 }
  0xd8   :  { %v3334_v11 = vpop.f32.mrb[0].mxu0 }
  0xd9   :  { %v158_v13 = vpop.f32.mrb[1].mxu0  ;;  %v164_v56 = vadd.f32 %v3334_v11, %v3339_v12 }
  0xda   :  { %v159_v14 = vadd.f32 %v3339_v12, %v158_v13 }
  0xdc   :  { %v3395_v43 = vpop.f32.mrb[2].mxu0 }
  0xdd   :  { %v3397_v44 = vpop.f32.mrb[3].mxu0 }
  0xde   :  { %v169_v34 = vadd.f32 %v3339_v12, %v3397_v44 }
  0xdf   :  { %v267_v15 = vpop.f32.mrb[0].mxu1 }
  0xe0   :  { %v271_v16 = vadd.f32 %v267_v15, %v159_v14  ;;  %v2663_v17 = vpop.f32.mrb[1].mxu1 }
  0xe1   :  { %v3399_v45 = vpop.f32.mrb[4].mxu0 }
  0xe2   :  { %3107 = vtanh.f32 %v271_v16  ;;  %v2464_v19 = vmul.f32 -1.442695, %v271_v16  ;;  %v3401_v46 = vpop.f32.mrb[5].mxu0 }
  0xe4   :  { %3109 = vpow2.f32 %v2464_v19 }
  0xe5   :  { %v3440_v54 = vpop.f32.mrb[6].mxu0 }
  0xe6   :  { %v3442_v55 = vpop.f32.mrb[7].mxu0 }
  0xec   :  { %v3108_v18 = vpop.eup %3107 }
  0xed   :  { %281 = vrot.lane.b32.xlu0 %v3108_v18, %s3238_s23 }
  0xee   :  { %v3110_v20 = vpop.eup %3109 }
  0xef   :  { %v275_v21 = vadd.f32 1.0, %v3110_v20 }
  0xf1   :  { %3111 = vrcp.f32 %v275_v21 }
  0xfb   :  { %v3112_v22 = vpop.eup %3111 }
  0xfc   :  { %v279_v25 = vmul.f32 0.0, %v3112_v22 }
 0x15f   :  { %v282_v23 = vpop.permute.xlu0 %281 }
 0x160   :  { %v284_v24 = vmul.f32 %v3112_v22, %v282_v23 }
 0x162   :  { %286 = vrot.lane.b32.xlu0 %v284_v24, %s3238_s23 }
 0x1d4   :  { %v287_v26 = vpop.permute.xlu0 %286 }
 0x1d5   :  { %v3344_v27 = vadd.f32 %v287_v26, %v279_v25 }
 0x1d7   :  { %3113 = vtanh.f32 %v3344_v27 }
 0x1e1   :  { %v3114_v40 = vpop.eup %3113 }
 0x1e2   :  { %292 = vrot.lane.b32.xlu1 %v3114_v40, %s3238_s23 }
 0x254   :  { %v293_v41 = vpop.permute.xlu1 %292 }
 0x255   :  { %v295_v42 = vmul.f32 %v3112_v22, %v293_v41 }
 0x257   :  { %297 = vrot.lane.b32.xlu1 %v295_v42, %s3239_s4 }
 0x2c9   :  { %v298_v52 = vpop.permute.xlu1 %297 }
 0x2ca   :  { %2673 = vmatmul.mubr.msk.f32.vlgmr.msra.gmra.mrb[2].mxu1 %vm197_vm3, %v298_v52  ;;  %2684 = vmatmul.mubr.msk.f32.vlgmr.msra.gmra.mrb[8].mxu0 %vm197_vm3, %v298_v52 }
 0x2cb   :  { %2948 = vmatpush3.bf16.msra.mxu0 %v3409_v49  ;;  %2694 = vmatprep.mubr.msk.f32.mxu0 %vm3236_vm2, %v3237_v8 }
 0x2cc   :  { %2949 = vmatprep.subr.bf16.mxu0 %v3235_v0  ;;  %2954 = vmatpush3.bf16.msra.mxu1 %v3300_v4 }
 0x2cd   :  { %2955 = vmatprep.subr.bf16.mxu1 %v3235_v0  ;;  %2705 = vmatprep.mubr.msk.f32.mxu1 %vm3236_vm2, %v3237_v8 }
 0x2cf   :  { %2951 = vmatpush3.bf16.msra.mxu0 %v3420_v53 }
 0x2d0   :  { %2957 = vmatpush3.bf16.msra.mxu1 %v3321_v10  ;;  %2970 = vmatprep.subr.bf16.mxu0 %v3235_v0 }
 0x2d1   :  { %2958 = vmatprep.subr.bf16.mxu1 %v3235_v0 }
 0x2d2   :  { %2695 = vmatmul.mubr.f32.vlgmr.msra.gmra.mrb[8].mxu0 %v3237_v8 }
 0x2d3   :  { %2972 = vmatpush3.bf16.msra.mxu0 %v3300_v4  ;;  %2738 = vmatprep.mubr.msk.f32.mxu0 %vm3236_vm2, %v3237_v8 }
 0x2d4   :  { %2973 = vmatprep.subr.bf16.mxu0 %v3235_v0 }
 0x2d7   :  { %2975 = vmatpush3.bf16.msra.mxu0 %v3321_v10 }
 0x2d8   :  { %2976 = vmatprep.subr.bf16.mxu0 %v3235_v0 }
 0x39d   :  { %v367_v57 = vpop.f32.mrb[2].mxu1 }
 0x39e   :  { %v371_v58 = vadd.f32 %v367_v57, %v164_v56  ;;  %v2674_v59 = vpop.f32.mrb[3].mxu1 }
 0x3a0   :  { %3115 = vtanh.f32 %v371_v58  ;;  %v2466_v3 = vmul.f32 -1.442695, %v371_v58 }
 0x3a5   :  { %v538_v61 = vpop.f32.mrb[8].mxu0 }
 0x3a6   :  { %v3078_v62 = vadd.f32 %v3449_v60, %v538_v61  ;;  %v2696_v63 = vpop.f32.mrb[9].mxu0 }
 0x3a8   :  { %3117 = vtanh.f32 %v3078_v62  ;;  %v2469_v5 = vmul.f32 -1.442695, %v3078_v62 }
 0x3a9   :  { %3119 = vpow2.f32 %v2466_v3 }
 0x3aa   :  { %v3116_v1 = vpop.eup %3115  ;;  %3121 = vpow2.f32 %v2469_v5 }
 0x3ab   :  { %381 = vrot.lane.b32.xlu0 %v3116_v1, %s3238_s23 }
 0x3b2   :  { %v3118_v2 = vpop.eup %3117 }
 0x3b3   :  { %552 = vrot.lane.b32.xlu1 %v3118_v2, %s3238_s23  ;;  %v3120_v6 = vpop.eup %3119 }
 0x3b4   :  { %v375_v7 = vadd.f32 1.0, %v3120_v6  ;;  %v3122_v9 = vpop.eup %3121 }
 0x3b5   :  { %v546_v11 = vadd.f32 1.0, %v3122_v9 }
 0x3b6   :  { %3123 = vrcp.f32 %v375_v7 }
 0x3b7   :  { %3125 = vrcp.f32 %v546_v11 }
 0x3c0   :  { %v3124_v13 = vpop.eup %3123 }
 0x3c1   :  { %v3126_v16 = vpop.eup %3125  ;;  %v379_v19 = vmul.f32 %v3124_v13, %v3344_v27 }
 0x3c2   :  { %v550_v22 = vmul.f32 0.0, %v3126_v16 }
 0x41d   :  { %v382_v14 = vpop.permute.xlu0 %381 }
 0x41e   :  { %v384_v15 = vmul.f32 %v3124_v13, %v382_v14 }
 0x420   :  { %386 = vrot.lane.b32.xlu0 %v384_v15, %s3238_s23 }
 0x425   :  { %v553_v17 = vpop.permute.xlu1 %552 }
 0x426   :  { %v555_v18 = vmul.f32 %v3126_v16, %v553_v17 }
 0x428   :  { %557 = vrot.lane.b32.xlu1 %v555_v18, %s3238_s23 }
 0x492   :  { %v387_v20 = vpop.permute.xlu0 %386 }
 0x493   :  { %v3457_v21 = vadd.f32 %v387_v20, %v379_v19  ;;  %v174_v19 = vadd.f32 %v3395_v43, %v3339_v12 }
 0x495   :  { %3127 = vtanh.f32 %v3457_v21 }
 0x49a   :  { %v558_v23 = vpop.permute.xlu1 %557 }
 0x49b   :  { %v3460_v24 = vadd.f32 %v558_v23, %v550_v22 }
 0x49d   :  { %3129 = vtanh.f32 %v3460_v24 }
 0x49f   :  { %v3128_v25 = vpop.eup %3127 }
 0x4a0   :  { %392 = vrot.lane.b32.xlu0 %v3128_v25, %s3238_s23 }
 0x4a7   :  { %v3130_v26 = vpop.eup %3129 }
 0x4a8   :  { %563 = vrot.lane.b32.xlu1 %v3130_v26, %s3238_s23 }
 0x512   :  { %v393_v28 = vpop.permute.xlu0 %392 }
 0x513   :  { %v395_v29 = vmul.f32 %v3124_v13, %v393_v28 }
 0x515   :  { %568 = vrot.lane.b32.xlu0 %v395_v29, %s3239_s4 }
 0x51a   :  { %v564_v27 = vpop.permute.xlu1 %563 }
 0x51b   :  { %v566_v30 = vmul.f32 %v3126_v16, %v564_v27 }
 0x51d   :  { %738 = vrot.lane.b32.xlu1 %v566_v30, %s3239_s4 }
 0x587   :  { %v569_v31 = vpop.permute.xlu0 %568 }
 0x588   :  { %2706 = vmatmul.mubr.msk.f32.vlgmr.msra.gmra.mrb[4].mxu1 %vm197_vm3, %v569_v31 }
 0x589   :  { %2960 = vmatpush3.bf16.msra.mxu1 %v3364_v33  ;;  %2716 = vmatprep.mubr.msk.f32.mxu1 %vm3236_vm2, %v3237_v8 }
 0x58a   :  { %2961 = vmatprep.subr.bf16.mxu1 %v3235_v0 }
 0x58d   :  { %2963 = vmatpush3.bf16.msra.mxu1 %v3380_v38 }
 0x58e   :  { %2964 = vmatprep.subr.bf16.mxu1 %v3235_v0 }
 0x58f   :  { %v739_v32 = vpop.permute.xlu1 %738 }
 0x590   :  { %2717 = vmatmul.mubr.msk.f32.vlgmr.msra.gmra.mrb[6].mxu1 %vm197_vm3, %v569_v31 }
 0x591   :  { %2966 = vmatpush3.bf16.msra.mxu1 %v3409_v49  ;;  %2727 = vmatprep.mubr.msk.f32.mxu1 %vm3236_vm2, %v3237_v8 }
 0x592   :  { %2967 = vmatprep.subr.bf16.mxu1 %v3235_v0 }
 0x595   :  { %2969 = vmatpush3.bf16.msra.mxu1 %v3420_v53 }
 0x596   :  { %2988 = vmatprep.subr.bf16.mxu1 %v3235_v0 }
 0x598   :  { %2728 = vmatmul.mubr.msk.f32.vlgmr.msra.gmra.mrb[6].mxu1 %vm197_vm3, %v739_v32 }
 0x599   :  { %2990 = vmatpush3.bf16.msra.mxu1 %v3300_v4  ;;  %2771 = vmatprep.mubr.msk.f32.mxu1 %vm3236_vm2, %v3237_v8 }
 0x59a   :  { %2991 = vmatprep.subr.bf16.mxu1 %v3235_v0 }
 0x59d   :  { %2993 = vmatpush3.bf16.msra.mxu1 %v3321_v10 }
 0x59e   :  { %2994 = vmatprep.subr.bf16.mxu1 %v3235_v0 }
 0x65b   :  { %v638_v35 = vpop.f32.mrb[4].mxu1 }
 0x65c   :  { %v642_v36 = vadd.f32 %v638_v35, %v169_v34  ;;  %v2707_v37 = vpop.f32.mrb[5].mxu1 }
 0x65e   :  { %3131 = vtanh.f32 %v642_v36  ;;  %v2471_v48 = vmul.f32 -1.442695, %v642_v36 }
 0x668   :  { %v3132_v39 = vpop.eup %3131 }
 0x669   :  { %652 = vrot.lane.b32.xlu0 %v3132_v39, %s3238_s23 }
 0x66b   :  { %v808_v40 = vpop.f32.mrb[6].mxu1 }
 0x66c   :  { %v3079_v41 = vadd.f32 %v3449_v60, %v808_v40  ;;  %v2729_v42 = vpop.f32.mrb[7].mxu1 }
 0x66e   :  { %3133 = vtanh.f32 %v3079_v41  ;;  %v2474_v51 = vmul.f32 -1.442695, %v3079_v41 }
 0x66f   :  { %3135 = vpow2.f32 %v2471_v48 }
 0x670   :  { %3137 = vpow2.f32 %v2474_v51 }
 0x678   :  { %v3134_v47 = vpop.eup %3133 }
 0x679   :  { %822 = vrot.lane.b32.xlu1 %v3134_v47, %s3238_s23  ;;  %v3136_v50 = vpop.eup %3135 }
 0x67a   :  { %v646_v44 = vadd.f32 1.0, %v3136_v50  ;;  %v3138_v52 = vpop.eup %3137 }
 0x67b   :  { %v816_v59 = vadd.f32 1.0, %v3138_v52 }
 0x67c   :  { %3139 = vrcp.f32 %v646_v44 }
 0x67d   :  { %3141 = vrcp.f32 %v816_v59 }
 0x686   :  { %v3140_v56 = vpop.eup %3139 }
 0x687   :  { %v3142_v61 = vpop.eup %3141  ;;  %v650_v1 = vmul.f32 %v3140_v56, %v3457_v21 }
 0x688   :  { %v820_v6 = vmul.f32 %v3142_v61, %v3460_v24 }
 0x6db   :  { %v653_v57 = vpop.permute.xlu0 %652 }
 0x6dc   :  { %v655_v58 = vmul.f32 %v3140_v56, %v653_v57 }
 0x6de   :  { %657 = vrot.lane.b32.xlu0 %v655_v58, %s3238_s23 }
 0x6eb   :  { %v823_v62 = vpop.permute.xlu1 %822 }
 0x6ec   :  { %v825_v63 = vmul.f32 %v3142_v61, %v823_v62 }
 0x6ee   :  { %827 = vrot.lane.b32.xlu1 %v825_v63, %s3238_s23  ;;  %v179_v63 = vadd.f32 %v3339_v12, %v3401_v46 }
 0x750   :  { %v658_v2 = vpop.permute.xlu0 %657 }
 0x751   :  { %v3496_v3 = vadd.f32 %v658_v2, %v650_v1 }
 0x753   :  { %3143 = vtanh.f32 %v3496_v3 }
 0x75d   :  { %v3144_v5 = vpop.eup %3143 }
 0x75e   :  { %663 = vrot.lane.b32.xlu0 %v3144_v5, %s3238_s23 }
 0x760   :  { %v828_v7 = vpop.permute.xlu1 %827 }
 0x761   :  { %v3501_v9 = vadd.f32 %v828_v7, %v820_v6 }
 0x763   :  { %3145 = vtanh.f32 %v3501_v9 }
 0x76d   :  { %v3146_v11 = vpop.eup %3145 }
 0x76e   :  { %833 = vrot.lane.b32.xlu1 %v3146_v11, %s3238_s23 }
 0x7d0   :  { %v664_v13 = vpop.permute.xlu0 %663 }
 0x7d1   :  { %v666_v14 = vmul.f32 %v3140_v56, %v664_v13 }
 0x7d3   :  { %838 = vrot.lane.b32.xlu0 %v666_v14, %s3239_s4 }
 0x7e0   :  { %v834_v15 = vpop.permute.xlu1 %833 }
 0x7e1   :  { %v836_v16 = vmul.f32 %v3142_v61, %v834_v15 }
 0x7e3   :  { %1008 = vrot.lane.b32.xlu1 %v836_v16, %s3239_s4 }
 0x845   :  { %v839_v17 = vpop.permute.xlu0 %838 }
 0x846   :  { %2739 = vmatmul.mubr.msk.f32.vlgmr.msra.gmra.mrb[10].mxu0 %vm197_vm3, %v839_v17 }
 0x847   :  { %2978 = vmatpush3.bf16.msra.mxu0 %v3364_v33  ;;  %2749 = vmatprep.mubr.msk.f32.mxu0 %vm3236_vm2, %v3237_v8 }
 0x848   :  { %2979 = vmatprep.subr.bf16.mxu0 %v3235_v0 }
 0x84b   :  { %2981 = vmatpush3.bf16.msra.mxu0 %v3380_v38 }
 0x84c   :  { %2982 = vmatprep.subr.bf16.mxu0 %v3235_v0 }
 0x84e   :  { %2750 = vmatmul.mubr.msk.f32.vlgmr.msra.gmra.mrb[12].mxu0 %vm197_vm3, %v839_v17 }
 0x84f   :  { %2984 = vmatpush3.bf16.msra.mxu0 %v3409_v49  ;;  %2760 = vmatprep.mubr.msk.f32.mxu0 %vm3236_vm2, %v3237_v8 }
 0x850   :  { %2985 = vmatprep.subr.bf16.mxu0 %v3235_v0 }
 0x853   :  { %2987 = vmatpush3.bf16.msra.mxu0 %v3420_v53 }
 0x854   :  { %3006 = vmatprep.subr.bf16.mxu0 %v3235_v0 }
 0x855   :  { %v1009_v18 = vpop.permute.xlu1 %1008 }
 0x856   :  { %2761 = vmatmul.mubr.msk.f32.vlgmr.msra.gmra.mrb[12].mxu0 %vm197_vm3, %v1009_v18 }
 0x857   :  { %3008 = vmatpush3.bf16.msra.mxu0 %v3300_v4  ;;  %2804 = vmatprep.mubr.msk.f32.mxu0 %vm3236_vm2, %v3237_v8 }
 0x858   :  { %3009 = vmatprep.subr.bf16.mxu0 %v3235_v0 }
 0x85b   :  { %3011 = vmatpush3.bf16.msra.mxu0 %v3321_v10 }
 0x85c   :  { %3012 = vmatprep.subr.bf16.mxu0 %v3235_v0 }
 0x919   :  { %v908_v20 = vpop.f32.mrb[10].mxu0 }
 0x91a   :  { %v912_v21 = vadd.f32 %v908_v20, %v174_v19  ;;  %v2740_v22 = vpop.f32.mrb[11].mxu0 }
 0x91c   :  { %3147 = vtanh.f32 %v912_v21  ;;  %v2476_v29 = vmul.f32 -1.442695, %v912_v21 }
 0x926   :  { %v3148_v23 = vpop.eup %3147 }
 0x927   :  { %922 = vrot.lane.b32.xlu0 %v3148_v23, %s3238_s23 }
 0x929   :  { %v1078_v24 = vpop.f32.mrb[12].mxu0 }
 0x92a   :  { %v3080_v25 = vadd.f32 %v3449_v60, %v1078_v24  ;;  %v2762_v26 = vpop.f32.mrb[13].mxu0 }
 0x92c   :  { %3149 = vtanh.f32 %v3080_v25  ;;  %v2479_v30 = vmul.f32 -1.442695, %v3080_v25 }
 0x92d   :  { %3151 = vpow2.f32 %v2476_v29 }
 0x92e   :  { %3153 = vpow2.f32 %v2479_v30 }
 0x936   :  { %v3150_v28 = vpop.eup %3149 }
 0x937   :  { %1092 = vrot.lane.b32.xlu1 %v3150_v28, %s3238_s23  ;;  %v3152_v27 = vpop.eup %3151 }
 0x938   :  { %v916_v43 = vadd.f32 1.0, %v3152_v27  ;;  %v3154_v31 = vpop.eup %3153 }
 0x939   :  { %v1086_v36 = vadd.f32 1.0, %v3154_v31 }
 0x93a   :  { %3155 = vrcp.f32 %v916_v43 }
 0x93b   :  { %3157 = vrcp.f32 %v1086_v36 }
 0x944   :  { %v3156_v32 = vpop.eup %3155 }
 0x945   :  { %v3158_v37 = vpop.eup %3157  ;;  %v920_v41 = vmul.f32 %v3156_v32, %v3496_v3 }
 0x946   :  { %v1090_v50 = vmul.f32 %v3158_v37, %v3501_v9 }
 0x999   :  { %v923_v34 = vpop.permute.xlu0 %922 }
 0x99a   :  { %v925_v35 = vmul.f32 %v3156_v32, %v923_v34 }
 0x99c   :  { %927 = vrot.lane.b32.xlu0 %v925_v35, %s3238_s23 }
 0x9a9   :  { %v1093_v39 = vpop.permute.xlu1 %1092 }
 0x9aa   :  { %v1095_v40 = vmul.f32 %v3158_v37, %v1093_v39  ;;  %v184_v39 = vadd.f32 %v3399_v45, %v3339_v12 }
 0x9ac   :  { %1097 = vrot.lane.b32.xlu1 %v1095_v40, %s3238_s23 }
 0xa0e   :  { %v928_v42 = vpop.permute.xlu0 %927 }
 0xa0f   :  { %v3536_v47 = vadd.f32 %v928_v42, %v920_v41 }
 0xa11   :  { %3159 = vtanh.f32 %v3536_v47 }
 0xa1b   :  { %v3160_v48 = vpop.eup %3159 }
 0xa1c   :  { %933 = vrot.lane.b32.xlu0 %v3160_v48, %s3238_s23 }
 0xa1e   :  { %v1098_v51 = vpop.permute.xlu1 %1097 }
 0xa1f   :  { %v3541_v44 = vadd.f32 %v1098_v51, %v1090_v50 }
 0xa21   :  { %3161 = vtanh.f32 %v3541_v44 }
 0xa2b   :  { %v3162_v52 = vpop.eup %3161 }
 0xa2c   :  { %1103 = vrot.lane.b32.xlu1 %v3162_v52, %s3238_s23 }
 0xa8e   :  { %v934_v56 = vpop.permute.xlu0 %933 }
 0xa8f   :  { %v936_v57 = vmul.f32 %v3156_v32, %v934_v56 }
 0xa91   :  { %1108 = vrot.lane.b32.xlu0 %v936_v57, %s3239_s4 }
 0xa9e   :  { %v1104_v58 = vpop.permute.xlu1 %1103 }
 0xa9f   :  { %v1106_v59 = vmul.f32 %v3158_v37, %v1104_v58 }
 0xaa1   :  { %1278 = vrot.lane.b32.xlu1 %v1106_v59, %s3239_s4 }
 0xb03   :  { %v1109_v61 = vpop.permute.xlu0 %1108 }
 0xb04   :  { %2772 = vmatmul.mubr.msk.f32.vlgmr.msra.gmra.mrb[8].mxu1 %vm197_vm3, %v1109_v61 }
 0xb05   :  { %2996 = vmatpush3.bf16.msra.mxu1 %v3364_v33  ;;  %2782 = vmatprep.mubr.msk.f32.mxu1 %vm3236_vm2, %v3237_v8 }
 0xb06   :  { %2997 = vmatprep.subr.bf16.mxu1 %v3235_v0 }
 0xb09   :  { %2999 = vmatpush3.bf16.msra.mxu1 %v3380_v38 }
 0xb0a   :  { %3000 = vmatprep.subr.bf16.mxu1 %v3235_v0 }
 0xb0c   :  { %2783 = vmatmul.mubr.msk.f32.vlgmr.msra.gmra.mrb[10].mxu1 %vm197_vm3, %v1109_v61 }
 0xb0d   :  { %3002 = vmatpush3.bf16.msra.mxu1 %v3409_v49  ;;  %2793 = vmatprep.mubr.msk.f32.mxu1 %vm3236_vm2, %v3237_v8 }
 0xb0e   :  { %3003 = vmatprep.subr.bf16.mxu1 %v3235_v0 }
 0xb11   :  { %3005 = vmatpush3.bf16.msra.mxu1 %v3420_v53 }
 0xb12   :  { %3024 = vmatprep.subr.bf16.mxu1 %v3235_v0 }
 0xb13   :  { %v1279_v62 = vpop.permute.xlu1 %1278 }
 0xb14   :  { %2794 = vmatmul.mubr.msk.f32.vlgmr.msra.gmra.mrb[10].mxu1 %vm197_vm3, %v1279_v62 }
 0xb15   :  { %3026 = vmatpush3.bf16.msra.mxu1 %v3300_v4  ;;  %2837 = vmatprep.mubr.msk.f32.mxu1 %vm3236_vm2, %v3237_v8 }
 0xb16   :  { %3027 = vmatprep.subr.bf16.mxu1 %v3235_v0 }
 0xb19   :  { %3029 = vmatpush3.bf16.msra.mxu1 %v3321_v10 }
 0xb1a   :  { %3030 = vmatprep.subr.bf16.mxu1 %v3235_v0 }
 0xbd7   :  { %v1178_v1 = vpop.f32.mrb[8].mxu1 }
 0xbd8   :  { %v1182_v2 = vadd.f32 %v1178_v1, %v179_v63  ;;  %v2773_v3 = vpop.f32.mrb[9].mxu1 }
 0xbda   :  { %3163 = vtanh.f32 %v1182_v2  ;;  %v2481_v13 = vmul.f32 -1.442695, %v1182_v2 }
 0xbe4   :  { %v3164_v5 = vpop.eup %3163 }
 0xbe5   :  { %1192 = vrot.lane.b32.xlu0 %v3164_v5, %s3238_s23 }
 0xbe7   :  { %v1348_v6 = vpop.f32.mrb[10].mxu1 }
 0xbe8   :  { %v3081_v7 = vadd.f32 %v3449_v60, %v1348_v6  ;;  %v2795_v9 = vpop.f32.mrb[11].mxu1 }
 0xbea   :  { %3165 = vtanh.f32 %v3081_v7  ;;  %v2484_v15 = vmul.f32 -1.442695, %v3081_v7 }
 0xbeb   :  { %3167 = vpow2.f32 %v2481_v13 }
 0xbec   :  { %3169 = vpow2.f32 %v2484_v15 }
 0xbf4   :  { %v3166_v11 = vpop.eup %3165 }
 0xbf5   :  { %1362 = vrot.lane.b32.xlu1 %v3166_v11, %s3238_s23  ;;  %v3168_v14 = vpop.eup %3167 }
 0xbf6   :  { %v1186_v46 = vadd.f32 1.0, %v3168_v14  ;;  %v3170_v16 = vpop.eup %3169 }
 0xbf7   :  { %v1356_v20 = vadd.f32 1.0, %v3170_v16 }
 0xbf8   :  { %3171 = vrcp.f32 %v1186_v46 }
 0xbf9   :  { %3173 = vrcp.f32 %v1356_v20 }
 0xc02   :  { %v3172_v17 = vpop.eup %3171 }
 0xc03   :  { %v3174_v21 = vpop.eup %3173  ;;  %v1190_v24 = vmul.f32 %v3172_v17, %v3536_v47 }
 0xc04   :  { %v1360_v29 = vmul.f32 %v3174_v21, %v3541_v44 }
 0xc57   :  { %v1193_v18 = vpop.permute.xlu0 %1192 }
 0xc58   :  { %v1195_v19 = vmul.f32 %v3172_v17, %v1193_v18 }
 0xc5a   :  { %1197 = vrot.lane.b32.xlu0 %v1195_v19, %s3238_s23  ;;  %v189_v19 = vadd.f32 %v3339_v12, %v3442_v55 }
 0xc67   :  { %v1363_v22 = vpop.permute.xlu1 %1362 }
 0xc68   :  { %v1365_v23 = vmul.f32 %v3174_v21, %v1363_v22 }
 0xc6a   :  { %1367 = vrot.lane.b32.xlu1 %v1365_v23, %s3238_s23 }
 0xccc   :  { %v1198_v25 = vpop.permute.xlu0 %1197 }
 0xccd   :  { %v3576_v26 = vadd.f32 %v1198_v25, %v1190_v24 }
 0xccf   :  { %3175 = vtanh.f32 %v3576_v26 }
 0xcd9   :  { %v3176_v28 = vpop.eup %3175 }
 0xcda   :  { %1203 = vrot.lane.b32.xlu0 %v3176_v28, %s3238_s23 }
 0xcdc   :  { %v1368_v27 = vpop.permute.xlu1 %1367 }
 0xcdd   :  { %v3581_v30 = vadd.f32 %v1368_v27, %v1360_v29 }
 0xcdf   :  { %3177 = vtanh.f32 %v3581_v30 }
 0xce9   :  { %v3178_v43 = vpop.eup %3177 }
 0xcea   :  { %1373 = vrot.lane.b32.xlu1 %v3178_v43, %s3238_s23 }
 0xd4c   :  { %v1204_v31 = vpop.permute.xlu0 %1203 }
 0xd4d   :  { %v1206_v32 = vmul.f32 %v3172_v17, %v1204_v31 }
 0xd4f   :  { %1378 = vrot.lane.b32.xlu0 %v1206_v32, %s3239_s4 }
 0xd5c   :  { %v1374_v34 = vpop.permute.xlu1 %1373 }
 0xd5d   :  { %v1376_v35 = vmul.f32 %v3174_v21, %v1374_v34 }
 0xd5f   :  { %1548 = vrot.lane.b32.xlu1 %v1376_v35, %s3239_s4 }
 0xdc1   :  { %v1379_v36 = vpop.permute.xlu0 %1378 }
 0xdc2   :  { %2805 = vmatmul.mubr.msk.f32.vlgmr.msra.gmra.mrb[14].mxu0 %vm197_vm3, %v1379_v36 }
 0xdc3   :  { %3014 = vmatpush3.bf16.msra.mxu0 %v3364_v33  ;;  %2815 = vmatprep.mubr.msk.f32.mxu0 %vm3236_vm2, %v3237_v8 }
 0xdc4   :  { %3015 = vmatprep.subr.bf16.mxu0 %v3235_v0 }
 0xdc7   :  { %3017 = vmatpush3.bf16.msra.mxu0 %v3380_v38 }
 0xdc8   :  { %3018 = vmatprep.subr.bf16.mxu0 %v3235_v0 }
 0xdca   :  { %2816 = vmatmul.mubr.msk.f32.vlgmr.msra.gmra.mrb[16].mxu0 %vm197_vm3, %v1379_v36 }
 0xdcb   :  { %3020 = vmatpush3.bf16.msra.mxu0 %v3409_v49  ;;  %2826 = vmatprep.mubr.msk.f32.mxu0 %vm3236_vm2, %v3237_v8 }
 0xdcc   :  { %3021 = vmatprep.subr.bf16.mxu0 %v3235_v0 }
 0xdcf   :  { %3023 = vmatpush3.bf16.msra.mxu0 %v3420_v53 }
 0xdd0   :  { %3042 = vmatprep.subr.bf16.mxu0 %v3235_v0 }
 0xdd1   :  { %v1549_v37 = vpop.permute.xlu1 %1548 }
 0xdd2   :  { %2827 = vmatmul.mubr.msk.f32.vlgmr.msra.gmra.mrb[16].mxu0 %vm197_vm3, %v1549_v37 }
 0xdd3   :  { %3044 = vmatpush3.bf16.msra.mxu0 %v3300_v4  ;;  %2870 = vmatprep.mubr.msk.f32.mxu0 %vm3236_vm2, %v3237_v8 }
 0xdd4   :  { %3045 = vmatprep.subr.bf16.mxu0 %v3235_v0 }
 0xdd7   :  { %3047 = vmatpush3.bf16.msra.mxu0 %v3321_v10 }
 0xdd8   :  { %3048 = vmatprep.subr.bf16.mxu0 %v3235_v0 }
 0xe95   :  { %v1448_v40 = vpop.f32.mrb[14].mxu0 }
 0xe96   :  { %v1452_v41 = vadd.f32 %v1448_v40, %v184_v39  ;;  %v2806_v42 = vpop.f32.mrb[15].mxu0 }
 0xe98   :  { %3179 = vtanh.f32 %v1452_v41  ;;  %v2486_v10 = vmul.f32 -1.442695, %v1452_v41 }
 0xea2   :  { %v3180_v47 = vpop.eup %3179 }
 0xea3   :  { %1462 = vrot.lane.b32.xlu0 %v3180_v47, %s3238_s23 }
 0xea5   :  { %v1618_v4 = vpop.f32.mrb[16].mxu0 }
 0xea6   :  { %v3082_v48 = vadd.f32 %v3449_v60, %v1618_v4  ;;  %v2828_v50 = vpop.f32.mrb[17].mxu0 }
 0xea8   :  { %3181 = vtanh.f32 %v3082_v48  ;;  %v2489_v52 = vmul.f32 -1.442695, %v3082_v48 }
 0xea9   :  { %3183 = vpow2.f32 %v2486_v10 }
 0xeaa   :  { %3185 = vpow2.f32 %v2489_v52 }
 0xeb2   :  { %v3182_v51 = vpop.eup %3181 }
 0xeb3   :  { %1632 = vrot.lane.b32.xlu1 %v3182_v51, %s3238_s23  ;;  %v3184_v44 = vpop.eup %3183 }
 0xeb4   :  { %v1456_v45 = vadd.f32 1.0, %v3184_v44  ;;  %v3186_v56 = vpop.eup %3185 }
 0xeb5   :  { %v1626_v61 = vadd.f32 1.0, %v3186_v56 }
 0xeb6   :  { %3187 = vrcp.f32 %v1456_v45 }
 0xeb7   :  { %3189 = vrcp.f32 %v1626_v61 }
 0xec0   :  { %v3188_v57 = vpop.eup %3187 }
 0xec1   :  { %v3190_v62 = vpop.eup %3189  ;;  %v1460_v2 = vmul.f32 %v3188_v57, %v3576_v26 }
 0xec2   :  { %v1630_v7 = vmul.f32 %v3190_v62, %v3581_v30 }
 0xf15   :  { %v1463_v58 = vpop.permute.xlu0 %1462 }
 0xf16   :  { %v1465_v59 = vmul.f32 %v3188_v57, %v1463_v58 }
 0xf18   :  { %1467 = vrot.lane.b32.xlu0 %v1465_v59, %s3238_s23 }
 0xf25   :  { %v1633_v63 = vpop.permute.xlu1 %1632 }
 0xf26   :  { %v1635_v1 = vmul.f32 %v3190_v62, %v1633_v63 }
 0xf28   :  { %1637 = vrot.lane.b32.xlu1 %v1635_v1, %s3238_s23 }
 0xf8a   :  { %v1468_v3 = vpop.permute.xlu0 %1467 }
 0xf8b   :  { %v3616_v5 = vadd.f32 %v1468_v3, %v1460_v2 }
 0xf8d   :  { %3191 = vtanh.f32 %v3616_v5 }
 0xf97   :  { %v3192_v6 = vpop.eup %3191 }
 0xf98   :  { %1473 = vrot.lane.b32.xlu0 %v3192_v6, %s3238_s23 }
 0xf9a   :  { %v1638_v9 = vpop.permute.xlu1 %1637 }
 0xf9b   :  { %v3621_v11 = vadd.f32 %v1638_v9, %v1630_v7 }
 0xf9d   :  { %3193 = vtanh.f32 %v3621_v11 }
 0xfa7   :  { %v3194_v13 = vpop.eup %3193 }
 0xfa8   :  { %1643 = vrot.lane.b32.xlu1 %v3194_v13, %s3238_s23 }
0x100a   :  { %v1474_v14 = vpop.permute.xlu0 %1473 }
0x100b   :  { %v1476_v15 = vmul.f32 %v3188_v57, %v1474_v14 }
0x100d   :  { %1648 = vrot.lane.b32.xlu0 %v1476_v15, %s3239_s4 }
0x101a   :  { %v1644_v46 = vpop.permute.xlu1 %1643 }
0x101b   :  { %v1646_v16 = vmul.f32 %v3190_v62, %v1644_v46 }
0x101d   :  { %1818 = vrot.lane.b32.xlu1 %v1646_v16, %s3239_s4 }
0x107f   :  { %v1649_v17 = vpop.permute.xlu0 %1648 }
0x1080   :  { %2838 = vmatmul.mubr.msk.f32.vlgmr.msra.gmra.mrb[12].mxu1 %vm197_vm3, %v1649_v17 }
0x1081   :  { %3032 = vmatpush3.bf16.msra.mxu1 %v3364_v33  ;;  %2848 = vmatprep.mubr.msk.f32.mxu1 %vm3236_vm2, %v3237_v8 }
0x1082   :  { %3033 = vmatprep.subr.bf16.mxu1 %v3235_v0 }
0x1085   :  { %3035 = vmatpush3.bf16.msra.mxu1 %v3380_v38 }
0x1086   :  { %3036 = vmatprep.subr.bf16.mxu1 %v3235_v0 }
0x1088   :  { %2849 = vmatmul.mubr.msk.f32.vlgmr.msra.gmra.mrb[14].mxu1 %vm197_vm3, %v1649_v17 }
0x1089   :  { %3038 = vmatpush3.bf16.msra.mxu1 %v3409_v49  ;;  %2859 = vmatprep.mubr.msk.f32.mxu1 %vm3236_vm2, %v3237_v8 }
0x108a   :  { %3039 = vmatprep.subr.bf16.mxu1 %v3235_v0 }
0x108d   :  { %3041 = vmatpush3.bf16.msra.mxu1 %v3420_v53 }
0x108e   :  { %3060 = vmatprep.subr.bf16.mxu1 %v3235_v0 }
0x108f   :  { %v1819_v18 = vpop.permute.xlu1 %1818 }
0x1090   :  { %2860 = vmatmul.mubr.msk.f32.vlgmr.msra.gmra.mrb[14].mxu1 %vm197_vm3, %v1819_v18 }
0x1091   :  { %3062 = vmatpush3.bf16.msra.mxu1 %v3364_v33  ;;  %2903 = vmatprep.mubr.msk.f32.mxu1 %vm3236_vm2, %v3237_v8 }
0x1092   :  { %3063 = vmatprep.subr.bf16.mxu1 %v3235_v0 }
0x1095   :  { %3065 = vmatpush3.bf16.msra.mxu1 %v3380_v38 }
0x1096   :  { %3066 = vmatprep.subr.bf16.mxu1 %v3235_v0 }
0x1153   :  { %v1718_v20 = vpop.f32.mrb[12].mxu1 }
0x1154   :  { %v1722_v21 = vadd.f32 %v1718_v20, %v189_v19  ;;  %v2839_v22 = vpop.f32.mrb[13].mxu1 }
0x1156   :  { %3195 = vtanh.f32 %v1722_v21  ;;  %v2491_v29 = vmul.f32 -1.442695, %v1722_v21 }
0x1160   :  { %v3196_v23 = vpop.eup %3195 }
0x1161   :  { %1732 = vrot.lane.b32.xlu0 %v3196_v23, %s3238_s23 }
0x1163   :  { %v1888_v24 = vpop.f32.mrb[14].mxu1 }
0x1164   :  { %v3083_v25 = vadd.f32 %v3449_v60, %v1888_v24  ;;  %v2861_v26 = vpop.f32.mrb[15].mxu1 }
0x1166   :  { %3197 = vtanh.f32 %v3083_v25  ;;  %v2494_v30 = vmul.f32 -1.442695, %v3083_v25 }
0x1167   :  { %3199 = vpow2.f32 %v2491_v29 }
0x1168   :  { %3201 = vpow2.f32 %v2494_v30 }
0x1170   :  { %v3198_v28 = vpop.eup %3197 }
0x1171   :  { %1902 = vrot.lane.b32.xlu1 %v3198_v28, %s3238_s23  ;;  %v3200_v27 = vpop.eup %3199 }
0x1172   :  { %v1726_v55 = vadd.f32 1.0, %v3200_v27  ;;  %v3202_v43 = vpop.eup %3201 }
0x1173   :  { %v1896_v35 = vadd.f32 1.0, %v3202_v43 }
0x1174   :  { %3203 = vrcp.f32 %v1726_v55 }
0x1175   :  { %3205 = vrcp.f32 %v1896_v35 }
0x117e   :  { %v3204_v31 = vpop.eup %3203 }
0x117f   :  { %v3206_v36 = vpop.eup %3205  ;;  %v1730_v40 = vmul.f32 %v3204_v31, %v3616_v5 }
0x1180   :  { %v1900_v4 = vmul.f32 %v3206_v36, %v3621_v11 }
0x11d3   :  { %v1733_v32 = vpop.permute.xlu0 %1732 }
0x11d4   :  { %v1735_v34 = vmul.f32 %v3204_v31, %v1733_v32 }
0x11d6   :  { %1737 = vrot.lane.b32.xlu0 %v1735_v34, %s3238_s23 }
0x11e3   :  { %v1903_v37 = vpop.permute.xlu1 %1902 }
0x11e4   :  { %v1905_v39 = vmul.f32 %v3206_v36, %v1903_v37 }
0x11e6   :  { %1907 = vrot.lane.b32.xlu1 %v1905_v39, %s3238_s23 }
0x1248   :  { %v1738_v41 = vpop.permute.xlu0 %1737 }
0x1249   :  { %v3656_v42 = vadd.f32 %v1738_v41, %v1730_v40  ;;  %v2363_v40 = vld [vmem:[%s3736_s7 + $0x8] sm:$0xff]  ;;  %v2364_v41 = vld [vmem:[%s3736_s7 + $0x10] sm:$0xff] }
0x124b   :  { %3207 = vtanh.f32 %v3656_v42 }
0x1255   :  { %v3208_v47 = vpop.eup %3207 }
0x1256   :  { %1743 = vrot.lane.b32.xlu0 %v3208_v47, %s3238_s23  ;;  %v2365_v47 = vld [vmem:[%s3736_s7 + $0x18] sm:$0xff] }
0x1258   :  { %v1908_v48 = vpop.permute.xlu1 %1907 }
0x1259   :  { %v3661_v50 = vadd.f32 %v1908_v48, %v1900_v4  ;;  %v3076_v4 = vpack.c.bf16 %v2365_v47, %v2364_v41 }
0x125b   :  { %3209 = vtanh.f32 %v3661_v50 }
0x1265   :  { %v3210_v51 = vpop.eup %3209 }
0x1266   :  { %1913 = vrot.lane.b32.xlu1 %v3210_v51, %s3238_s23 }
0x12c8   :  { %v1744_v10 = vpop.permute.xlu0 %1743 }
0x12c9   :  { %v1746_v44 = vmul.f32 %v3204_v31, %v1744_v10 }
0x12cb   :  { %1918 = vrot.lane.b32.xlu0 %v1746_v44, %s3239_s4 }
0x12d8   :  { %v1914_v52 = vpop.permute.xlu1 %1913 }
0x12d9   :  { %v1916_v45 = vmul.f32 %v3206_v36, %v1914_v52 }
0x12db   :  { %2088 = vrot.lane.b32.xlu1 %v1916_v45, %s3239_s4 }
0x133d   :  { %v1919_v56 = vpop.permute.xlu0 %1918 }
0x133e   :  { %2871 = vmatmul.mubr.msk.f32.vlgmr.msra.gmra.mrb[18].mxu0 %vm197_vm3, %v1919_v56 }
0x133f   :  { %3050 = vmatpush3.bf16.msra.mxu0 %v3364_v33  ;;  %2881 = vmatprep.mubr.msk.f32.mxu0 %vm3236_vm2, %v3237_v8 }
0x1340   :  { %3051 = vmatprep.subr.bf16.mxu0 %v3235_v0 }
0x1343   :  { %3053 = vmatpush3.bf16.msra.mxu0 %v3380_v38  ;;  %v194_v38 = vadd.f32 %v3440_v54, %v3339_v12 }
0x1344   :  { %3054 = vmatprep.subr.bf16.mxu0 %v3235_v0 }
0x1346   :  { %2882 = vmatmul.mubr.msk.f32.vlgmr.msra.gmra.mrb[20].mxu0 %vm197_vm3, %v1919_v56 }
0x1347   :  { %3056 = vmatpush3.bf16.msra.mxu0 %v3409_v49  ;;  %2892 = vmatprep.mubr.msk.f32.mxu0 %vm3236_vm2, %v3237_v8 }
0x1348   :  { %3057 = vmatprep.subr.bf16.mxu0 %v3235_v0 }
0x134b   :  { %3059 = vmatpush3.bf16.msra.mxu0 %v3420_v53 }
0x134c   :  { %3072 = vmatprep.subr.bf16.mxu0 %v3235_v0 }
0x134d   :  { %v2089_v33 = vpop.permute.xlu1 %2088 }
0x134e   :  { %2893 = vmatmul.mubr.msk.f32.vlgmr.msra.gmra.mrb[20].mxu0 %vm197_vm3, %v2089_v33 }
0x134f   :  { %2925 = vmatprep.mubr.msk.f32.mxu0 %vm3236_vm2, %v3237_v8 }
0x1411   :  { %v1988_v57 = vpop.f32.mrb[18].mxu0 }
0x1412   :  { %v1992_v58 = vadd.f32 %v1988_v57, %v194_v38  ;;  %v2872_v59 = vpop.f32.mrb[19].mxu0 }
0x1414   :  { %3211 = vtanh.f32 %v1992_v58  ;;  %v2496_v3 = vmul.f32 -1.442695, %v1992_v58 }
0x141e   :  { %v3212_v61 = vpop.eup %3211 }
0x141f   :  { %2002 = vrot.lane.b32.xlu0 %v3212_v61, %s3238_s23 }
0x1421   :  { %v2158_v62 = vpop.f32.mrb[20].mxu0 }
0x1422   :  { %v3084_v63 = vadd.f32 %v3449_v60, %v2158_v62  ;;  %v2894_v1 = vpop.f32.mrb[21].mxu0 }
0x1424   :  { %3213 = vtanh.f32 %v3084_v63  ;;  %v2499_v6 = vmul.f32 -1.442695, %v3084_v63 }
0x1425   :  { %3215 = vpow2.f32 %v2496_v3 }
0x1426   :  { %3217 = vpow2.f32 %v2499_v6 }
0x142e   :  { %v3214_v2 = vpop.eup %3213 }
0x142f   :  { %2172 = vrot.lane.b32.xlu1 %v3214_v2, %s3238_s23  ;;  %v3216_v5 = vpop.eup %3215 }
0x1430   :  { %v1996_v12 = vadd.f32 1.0, %v3216_v5  ;;  %v3218_v54 = vpop.eup %3217 }
0x1431   :  { %v2166_v13 = vadd.f32 1.0, %v3218_v54 }
0x1432   :  { %3219 = vrcp.f32 %v1996_v12 }
0x1433   :  { %3221 = vrcp.f32 %v2166_v13 }
0x143c   :  { %v3220_v7 = vpop.eup %3219 }
0x143d   :  { %v3222_v14 = vpop.eup %3221  ;;  %v2000_v16 = vmul.f32 %v3220_v7, %v3656_v42 }
0x143e   :  { %v2170_v20 = vmul.f32 %v3222_v14, %v3661_v50  ;;  %v14_v50 = vstv %s3737_s8 }
0x143f   :  { %15 = vst [vmem:[#allocation2] sm:$0x1] %v14_v50 }
0x1446   :  { %v2503_v52 = vld [vmem:[#allocation2] ss:$0 sm:$0xff] }
0x1491   :  { %v2003_v9 = vpop.permute.xlu0 %2002 }
0x1492   :  { %v2005_v11 = vmul.f32 %v3220_v7, %v2003_v9 }
0x1494   :  { %2007 = vrot.lane.b32.xlu0 %v2005_v11, %s3238_s23 }
0x14a1   :  { %v2173_v15 = vpop.permute.xlu1 %2172 }
0x14a2   :  { %v2175_v46 = vmul.f32 %v3222_v14, %v2173_v15 }
0x14a4   :  { %2177 = vrot.lane.b32.xlu1 %v2175_v46, %s3238_s23 }
0x1506   :  { %v2008_v17 = vpop.permute.xlu0 %2007 }
0x1507   :  { %v2010_v18 = vadd.f32 %v2008_v17, %v2000_v16 }
0x1509   :  { %3223 = vtanh.f32 %v2010_v18 }
0x1513   :  { %v3224_v19 = vpop.eup %3223 }
0x1514   :  { %2013 = vrot.lane.b32.xlu0 %v3224_v19, %s3238_s23 }
0x1516   :  { %v2178_v21 = vpop.permute.xlu1 %2177 }
0x1517   :  { %v2180_v22 = vadd.f32 %v2178_v21, %v2170_v20 }
0x1519   :  { %3225 = vtanh.f32 %v2180_v22 }
0x1523   :  { %v3226_v23 = vpop.eup %3225 }
0x1524   :  { %2183 = vrot.lane.b32.xlu1 %v3226_v23, %s3238_s23 }
0x1586   :  { %v2014_v24 = vpop.permute.xlu0 %2013 }
0x1587   :  { %v2016_v25 = vmul.f32 %v3220_v7, %v2014_v24 }
0x1589   :  { %2188 = vrot.lane.b32.xlu0 %v2016_v25, %s3239_s4 }
0x1596   :  { %v2184_v26 = vpop.permute.xlu1 %2183 }
0x1597   :  { %v2186_v28 = vmul.f32 %v3222_v14, %v2184_v26 }
0x1599   :  { %2263 = vrot.lane.b32.xlu1 %v2186_v28, %s3239_s4 }
0x15fb   :  { %v2189_v29 = vpop.permute.xlu0 %2188 }
0x15fc   :  { %2904 = vmatmul.mubr.msk.f32.vlgmr.msra.gmra.mrb[16].mxu1 %vm197_vm3, %v2189_v29 }
0x15fd   :  { %3068 = vmatpush3.bf16.msra.mxu1 %v3409_v49  ;;  %2914 = vmatprep.mubr.msk.f32.mxu1 %vm3236_vm2, %v3237_v8 }
0x15fe   :  { %3069 = vmatprep.subr.bf16.mxu1 %v3235_v0 }
0x1601   :  { %3071 = vmatpush3.bf16.msra.mxu1 %v3420_v53 }
0x160b   :  { %v2264_v27 = vpop.permute.xlu1 %2263 }
0x160c   :  { %2915 = vmatmul.mubr.msk.f32.vlgmr.msra.gmra.mrb[16].mxu1 %vm197_vm3, %v2264_v27 }
0x16df   :  { %v2333_v30 = vpop.f32.mrb[16].mxu1 }
0x16e0   :  { %v3085_v55 = vadd.f32 %v3449_v60, %v2333_v30  ;;  %v2916_v43 = vpop.f32.mrb[17].mxu1  ;;  %v2362_v60 = vld [vmem:[%s3736_s7] sm:$0xff] }
0x16e1   :  { %v3073_v42 = vpack.c.bf16 %v2363_v40, %v2362_v60 }
0x16e2   :  { %3227 = vtanh.f32 %v3085_v55  ;;  %v2502_v32 = vmul.f32 -1.442695, %v3085_v55 }
0x16e3   :  { %3074 = vmatpush3.bf16.msra.mxu0 %v3073_v42 }
0x16e4   :  { %3229 = vpow2.f32 %v2502_v32  ;;  %3075 = vmatprep.subr.bf16.mxu0 %v3235_v0 }
0x16e7   :  { %3077 = vmatpush3.bf16.msra.mxu0 %v3076_v4 }
0x16ec   :  { %v3228_v31 = vpop.eup %3227 }
0x16ed   :  { %2347 = vrot.lane.b32.xlu0 %v3228_v31, %s3238_s23 }
0x16ee   :  { %v3230_v49 = vpop.eup %3229 }
0x16ef   :  { %v2341_v34 = vadd.f32 1.0, %v3230_v49 }
0x16f1   :  { %3231 = vrcp.f32 %v2341_v34 }
0x16fb   :  { %v3232_v8 = vpop.eup %3231 }
0x16fc   :  { %v2345_v53 = vmul.f32 %v3232_v8, %v2180_v22 }
0x175f   :  { %v2348_v35 = vpop.permute.xlu0 %2347 }
0x1760   :  { %v2350_v36 = vmul.f32 %v3232_v8, %v2348_v35 }
0x1762   :  { %2352 = vrot.lane.b32.xlu1 %v2350_v36, %s3238_s23 }
0x17d4   :  { %v2353_v37 = vpop.permute.xlu1 %2352 }
0x17d5   :  { %v2355_v39 = vadd.f32 %v2353_v37, %v2345_v53 }
0x17d7   :  { %3233 = vtanh.f32 %v2355_v39 }
0x17e1   :  { %v3234_v48 = vpop.eup %3233 }
0x17e2   :  { %2358 = vrot.lane.b32.xlu0 %v3234_v48, %s3238_s23 }
0x1854   :  { %v2359_v51 = vpop.permute.xlu0 %2358 }
0x1855   :  { %v2361_v10 = vmul.f32 %v3232_v8, %v2359_v51 }
0x1857   :  { %2374 = vrot.lane.b32.xlu1 %v2361_v10, %s3239_s4 }
0x18c9   :  { %v2375_v44 = vpop.permute.xlu1 %2374 }
0x18ca   :  { %2926 = vmatmul.mubr.msk.f32.vlgmr.msra.gmra.mrb[22].mxu0 %vm197_vm3, %v2375_v44 }
0x199d   :  { %v2444_v45 = vpop.f32.mrb[22].mxu0 }
0x199e   :  { %v2445_v0 = vadd.f32 %v2503_v52, %v2444_v45  ;;  %v2927_v56 = vpop.f32.mrb[23].mxu0 }
0x19a0   :  { %2449 = vst.msk [vmem:[%s3738_s9] sm:$0xff] %vm2448_vm4, %v2445_v0 }

</bundles_post_ra>
